<compile_context>
chip_gen: v7x
topology: tpu7x:2x2x1
jax: 0.10.0
libtpu: 0.0.40
codegen_flags: <defaults>
</compile_context>

<pallas_src>
import numpy as np
import jax
import jax.numpy as jnp
from jax.experimental import pallas as pl
from jax.experimental.pallas import tpu as pltpu

# Logical (PyTorch) dims.
INPUT_DIM = 784
HIDDEN_DIM = 400
LATENT_Z = 25

# Padded (lane/MXU aligned) dims. Input is NOT padded (784 = full last dim).
HIDDEN_PAD = 512  # 4 * 128
HEAD_PAD = 128    # fused mu|logvar head: mu @ lanes [0,25), logvar @ [64,89)
LV_OFFSET = 64


def universal_encoder_kernel(x_ref, w1_ref, b1_ref, w2_ref, b2_ref,
                             wh_ref, bh_ref, head_ref):
    f32 = jnp.float32
    bf16 = jnp.bfloat16

    x = x_ref[...]                                             # (TB, 784) bf16

    # Layer 1: Linear(784 -> 400) + ReLU   (hidden padded to 512 with zeros)
    h = jnp.dot(x, w1_ref[...], preferred_element_type=f32) + b1_ref[...]
    h = jnp.maximum(h, 0.0).astype(bf16)

    # Layer 2: Linear(400 -> 400) + ReLU   (512 -> 512 padded)
    h = jnp.dot(h, w2_ref[...], preferred_element_type=f32) + b2_ref[...]
    h = jnp.maximum(h, 0.0).astype(bf16)

    # Fused heads: [mu | logvar] in one lane-dense 128-wide matmul.
    head_ref[...] = (jnp.dot(h, wh_ref[...], preferred_element_type=f32)
                     + bh_ref[...])                             # (TB, 128) f32


def _round16(n):
    return ((n + 15) // 16) * 16


def universal_encoder_forward(x, packed_params, *, tb=None):
    """x: (B, 784) f32. Returns (mu, logvar), each (B, 25) f32."""
    w1, b1, w2, b2, wh, bh = packed_params
    B = x.shape[0]

    # Batch tile: multiple of 16 (bf16 sublane packing). For B >= 256 make the
    # grid have >= 2 steps (v7x megacore) with tiles up to 512 rows.
    if tb is None:
        if B >= 256:
            tb = min(512, _round16(pl.cdiv(B, 2)))
        else:
            tb = _round16(B)
    tb = max(16, _round16(tb))
    Bp = pl.cdiv(B, tb) * tb

    # bf16 cast + batch-row zero pad only (no lane padding, no extra copy of x).
    xb = x.astype(jnp.bfloat16)
    if Bp != B:
        xb = jnp.pad(xb, ((0, Bp - B), (0, 0)))

    resident = dict(pipeline_mode=pl.Buffered(1))  # weights: single VMEM buffer

    head = pl.pallas_call(
        universal_encoder_kernel,
        out_shape=jax.ShapeDtypeStruct((Bp, HEAD_PAD), jnp.float32),
        grid_spec=pltpu.PrefetchScalarGridSpec(
            num_scalar_prefetch=0,
            grid=(Bp // tb,),
            in_specs=[
                pl.BlockSpec((tb, INPUT_DIM), lambda i: (i, 0)),            # x tile
                pl.BlockSpec((INPUT_DIM, HIDDEN_PAD), lambda i: (0, 0),     # w1
                             **resident),
                pl.BlockSpec((1, HIDDEN_PAD), lambda i: (0, 0), **resident),   # b1
                pl.BlockSpec((HIDDEN_PAD, HIDDEN_PAD), lambda i: (0, 0),       # w2
                             **resident),
                pl.BlockSpec((1, HIDDEN_PAD), lambda i: (0, 0), **resident),   # b2
                pl.BlockSpec((HIDDEN_PAD, HEAD_PAD), lambda i: (0, 0),         # wh
                             **resident),
                pl.BlockSpec((1, HEAD_PAD), lambda i: (0, 0), **resident),     # bh
            ],
            out_specs=pl.BlockSpec((tb, HEAD_PAD), lambda i: (i, 0)),
        ),
        compiler_params=pltpu.CompilerParams(
            dimension_semantics=("parallel",),
            vmem_limit_bytes=32 << 20,
        ),
    )(xb, w1, b1, w2, b2, wh, bh)

    mu = head[:B, :LATENT_Z]
    logvar = head[:B, LV_OFFSET:LV_OFFSET + LATENT_Z]
    return mu, logvar


# ------------------------ deterministic parameter init ------------------------

def _torch_linear_init(key, fan_in, fan_out):
    """PyTorch nn.Linear default init; stored as (in, out) + bias (out,)."""
    kw, kb = jax.random.split(key)
    bound = 1.0 / np.sqrt(fan_in)
    w = jax.random.uniform(kw, (fan_in, fan_out), jnp.float32, -bound, bound)
    b = jax.random.uniform(kb, (fan_out,), jnp.float32, -bound, bound)
    return w, b


def init_universal_encoder_params(key):
    k1, k2, k3, k4 = jax.random.split(key, 4)
    w1, b1 = _torch_linear_init(k1, INPUT_DIM, HIDDEN_DIM)
    w2, b2 = _torch_linear_init(k2, HIDDEN_DIM, HIDDEN_DIM)
    wmu, bmu = _torch_linear_init(k3, HIDDEN_DIM, LATENT_Z)
    wlv, blv = _torch_linear_init(k4, HIDDEN_DIM, LATENT_Z)
    return (w1, b1, w2, b2, wmu, bmu, wlv, blv)


def pack_params(params):
    """Zero-pad hidden dims to 512, cast weights to bf16, fuse mu/logvar heads."""
    w1, b1, w2, b2, wmu, bmu, wlv, blv = params
    bf16 = jnp.bfloat16

    # w1: (784, 512) -- no input-dim padding.
    w1p = (jnp.zeros((INPUT_DIM, HIDDEN_PAD), bf16)
           .at[:, :HIDDEN_DIM].set(w1.astype(bf16)))
    b1p = jnp.zeros((1, HIDDEN_PAD), jnp.float32).at[:, :HIDDEN_DIM].set(b1)

    w2p = (jnp.zeros((HIDDEN_PAD, HIDDEN_PAD), bf16)
           .at[:HIDDEN_DIM, :HIDDEN_DIM].set(w2.astype(bf16)))
    b2p = jnp.zeros((1, HIDDEN_PAD), jnp.float32).at[:, :HIDDEN_DIM].set(b2)

    whp = (jnp.zeros((HIDDEN_PAD, HEAD_PAD), bf16)
           .at[:HIDDEN_DIM, :LATENT_Z].set(wmu.astype(bf16))
           .at[:HIDDEN_DIM, LV_OFFSET:LV_OFFSET + LATENT_Z].set(wlv.astype(bf16)))
    bhp = (jnp.zeros((1, HEAD_PAD), jnp.float32)
           .at[:, :LATENT_Z].set(bmu)
           .at[:, LV_OFFSET:LV_OFFSET + LATENT_Z].set(blv))

    return (w1p, b1p, w2p, b2p, whp, bhp)


# ------------------------------ pure-JAX reference ----------------------------

def universal_encoder_reference(x, params):
    w1, b1, w2, b2, wmu, bmu, wlv, blv = params
    h = jnp.maximum(x @ w1 + b1, 0.0)
    h = jnp.maximum(h @ w2 + b2, 0.0)
    return h @ wmu + bmu, h @ wlv + blv


if __name__ == "__main__":
    B = 40
    key = jax.random.PRNGKey(0)
    k_param, k_x = jax.random.split(key)

    params = init_universal_encoder_params(k_param)
    packed = pack_params(params)
    x = jax.random.uniform(k_x, (B, INPUT_DIM), jnp.float32)   # MNIST-like pixels

    mu_ref, lv_ref = universal_encoder_reference(x, params)

    # Default tiling (single tile, tb rounded up to 48).
    mu, logvar = universal_encoder_forward(x, packed)
    mu, logvar = jax.block_until_ready((mu, logvar))
    assert mu.shape == (B, LATENT_Z) and logvar.shape == (B, LATENT_Z)
    np.testing.assert_allclose(np.asarray(mu), np.asarray(mu_ref), rtol=2e-2, atol=2e-2)
    np.testing.assert_allclose(np.asarray(logvar), np.asarray(lv_ref), rtol=2e-2, atol=2e-2)

    # Multi-step grid (exercises batch tiling + row padding): tb=16 -> 3 steps.
    mu2, logvar2 = universal_encoder_forward(x, packed, tb=16)
    mu2, logvar2 = jax.block_until_ready((mu2, logvar2))
    np.testing.assert_allclose(np.asarray(mu2), np.asarray(mu_ref), rtol=2e-2, atol=2e-2)
    np.testing.assert_allclose(np.asarray(logvar2), np.asarray(lv_ref), rtol=2e-2, atol=2e-2)

    print("KERNEL_OK")
</pallas_src>

<mosaic_0001>
module attributes {stable_mosaic.version = 11 : i64} {
  func.func @universal_encoder_kernel(%arg0: i32, %arg1: memref<48x784xbf16, #tpu.memory_space<vmem>>, %arg2: memref<784x512xbf16, #tpu.memory_space<vmem>>, %arg3: memref<1x512xf32, #tpu.memory_space<vmem>>, %arg4: memref<512x512xbf16, #tpu.memory_space<vmem>>, %arg5: memref<1x512xf32, #tpu.memory_space<vmem>>, %arg6: memref<512x128xbf16, #tpu.memory_space<vmem>>, %arg7: memref<1x128xf32, #tpu.memory_space<vmem>>, %arg8: memref<48x128xf32, #tpu.memory_space<vmem>>) attributes {dimension_semantics = [#tpu.dimension_semantics<parallel>], iteration_bounds = array<i64: 1>, scalar_prefetch = 0 : i64, scratch_operands = 0 : i64, tpu.core_type = #tpu.core_type<tc>, window_params = [{transform_indices = @transform_0, window_bounds = array<i64: 48, 784>}, {pipeline_mode = #tpu.pipeline_mode<synchronous>, transform_indices = @transform_1, window_bounds = array<i64: 784, 512>}, {pipeline_mode = #tpu.pipeline_mode<synchronous>, transform_indices = @transform_2, window_bounds = array<i64: 1, 512>}, {pipeline_mode = #tpu.pipeline_mode<synchronous>, transform_indices = @transform_3, window_bounds = array<i64: 512, 512>}, {pipeline_mode = #tpu.pipeline_mode<synchronous>, transform_indices = @transform_4, window_bounds = array<i64: 1, 512>}, {pipeline_mode = #tpu.pipeline_mode<synchronous>, transform_indices = @transform_5, window_bounds = array<i64: 512, 128>}, {pipeline_mode = #tpu.pipeline_mode<synchronous>, transform_indices = @transform_6, window_bounds = array<i64: 1, 128>}, {transform_indices = @transform_7, window_bounds = array<i64: 48, 128>}]} {
    %c0 = arith.constant 0 : index
    %c0_0 = arith.constant 0 : index
    %0 = vector.load %arg1[%c0, %c0_0] : memref<48x784xbf16, #tpu.memory_space<vmem>>, vector<48x784xbf16>
    %c0_1 = arith.constant 0 : index
    %c0_2 = arith.constant 0 : index
    %1 = vector.load %arg2[%c0_1, %c0_2] : memref<784x512xbf16, #tpu.memory_space<vmem>>, vector<784x512xbf16>
    %cst = arith.constant dense<0.000000e+00> : vector<48x512xf32>
    %2 = tpu.matmul %0, %1, %cst {dimension_numbers = #tpu.dot_dimension_numbers<[1], [0], [0], [1], [0, 0, 1, 1], [], []>} : vector<48x784xbf16>, vector<784x512xbf16>, vector<48x512xf32> -> vector<48x512xf32>
    %c0_3 = arith.constant 0 : index
    %c0_4 = arith.constant 0 : index
    %3 = vector.load %arg3[%c0_3, %c0_4] : memref<1x512xf32, #tpu.memory_space<vmem>>, vector<1x512xf32>
    %4 = vector.broadcast %3 : vector<1x512xf32> to vector<48x512xf32>
    %5 = arith.addf %2, %4 : vector<48x512xf32>
    %cst_5 = arith.constant 0.000000e+00 : f32
    %6 = vector.broadcast %cst_5 : f32 to vector<48x512xf32>
    %7 = arith.maximumf %5, %6 : vector<48x512xf32>
    %8 = arith.truncf %7 : vector<48x512xf32> to vector<48x512xbf16>
    %c0_6 = arith.constant 0 : index
    %c0_7 = arith.constant 0 : index
    %9 = vector.load %arg4[%c0_6, %c0_7] : memref<512x512xbf16, #tpu.memory_space<vmem>>, vector<512x512xbf16>
    %cst_8 = arith.constant dense<0.000000e+00> : vector<48x512xf32>
    %10 = tpu.matmul %8, %9, %cst_8 {dimension_numbers = #tpu.dot_dimension_numbers<[1], [0], [0], [1], [0, 0, 1, 1], [], []>} : vector<48x512xbf16>, vector<512x512xbf16>, vector<48x512xf32> -> vector<48x512xf32>
    %c0_9 = arith.constant 0 : index
    %c0_10 = arith.constant 0 : index
    %11 = vector.load %arg5[%c0_9, %c0_10] : memref<1x512xf32, #tpu.memory_space<vmem>>, vector<1x512xf32>
    %12 = vector.broadcast %11 : vector<1x512xf32> to vector<48x512xf32>
    %13 = arith.addf %10, %12 : vector<48x512xf32>
    %cst_11 = arith.constant 0.000000e+00 : f32
    %14 = vector.broadcast %cst_11 : f32 to vector<48x512xf32>
    %15 = arith.maximumf %13, %14 : vector<48x512xf32>
    %16 = arith.truncf %15 : vector<48x512xf32> to vector<48x512xbf16>
    %c0_12 = arith.constant 0 : index
    %c0_13 = arith.constant 0 : index
    %17 = vector.load %arg6[%c0_12, %c0_13] : memref<512x128xbf16, #tpu.memory_space<vmem>>, vector<512x128xbf16>
    %cst_14 = arith.constant dense<0.000000e+00> : vector<48x128xf32>
    %18 = tpu.matmul %16, %17, %cst_14 {dimension_numbers = #tpu.dot_dimension_numbers<[1], [0], [0], [1], [0, 0, 1, 1], [], []>} : vector<48x512xbf16>, vector<512x128xbf16>, vector<48x128xf32> -> vector<48x128xf32>
    %c0_15 = arith.constant 0 : index
    %c0_16 = arith.constant 0 : index
    %19 = vector.load %arg7[%c0_15, %c0_16] : memref<1x128xf32, #tpu.memory_space<vmem>>, vector<1x128xf32>
    %20 = vector.broadcast %19 : vector<1x128xf32> to vector<48x128xf32>
    %21 = arith.addf %18, %20 : vector<48x128xf32>
    %c0_17 = arith.constant 0 : index
    %c0_18 = arith.constant 0 : index
    %22 = vector.load %arg8[%c0_17, %c0_18] : memref<48x128xf32, #tpu.memory_space<vmem>>, vector<48x128xf32>
    tpu.vector_store %arg8[%c0_17, %c0_18], %21 {strides = array<i32>} : memref<48x128xf32, #tpu.memory_space<vmem>>, vector<48x128xf32>,
    return
  }
  func.func @transform_0(%arg0: i32) -> (i32, i32) {
    %c0_i32 = arith.constant 0 : i32
    %c0_i32_0 = arith.constant 0 : i32
    return %arg0, %c0_i32 : i32, i32
  }
  func.func @transform_1(%arg0: i32) -> (i32, i32) {
    %c0_i32 = arith.constant 0 : i32
    %c0_i32_0 = arith.constant 0 : i32
    %c0_i32_1 = arith.constant 0 : i32
    return %c0_i32, %c0_i32_0 : i32, i32
  }
  func.func @transform_2(%arg0: i32) -> (i32, i32) {
    %c0_i32 = arith.constant 0 : i32
    %c0_i32_0 = arith.constant 0 : i32
    %c0_i32_1 = arith.constant 0 : i32
    return %c0_i32, %c0_i32_0 : i32, i32
  }
  func.func @transform_3(%arg0: i32) -> (i32, i32) {
    %c0_i32 = arith.constant 0 : i32
    %c0_i32_0 = arith.constant 0 : i32
    %c0_i32_1 = arith.constant 0 : i32
    return %c0_i32, %c0_i32_0 : i32, i32
  }
  func.func @transform_4(%arg0: i32) -> (i32, i32) {
    %c0_i32 = arith.constant 0 : i32
    %c0_i32_0 = arith.constant 0 : i32
    %c0_i32_1 = arith.constant 0 : i32
    return %c0_i32, %c0_i32_0 : i32, i32
  }
  func.func @transform_5(%arg0: i32) -> (i32, i32) {
    %c0_i32 = arith.constant 0 : i32
    %c0_i32_0 = arith.constant 0 : i32
    %c0_i32_1 = arith.constant 0 : i32
    return %c0_i32, %c0_i32_0 : i32, i32
  }
  func.func @transform_6(%arg0: i32) -> (i32, i32) {
    %c0_i32 = arith.constant 0 : i32
    %c0_i32_0 = arith.constant 0 : i32
    %c0_i32_1 = arith.constant 0 : i32
    return %c0_i32, %c0_i32_0 : i32, i32
  }
  func.func @transform_7(%arg0: i32) -> (i32, i32) {
    %c0_i32 = arith.constant 0 : i32
    %c0_i32_0 = arith.constant 0 : i32
    return %arg0, %c0_i32 : i32, i32
  }
}

</mosaic_0001>

<bundles_post_ra>
// kernel: tpu_custom_call.1
= control target key start
LH: loop header
LB: loop body
LE: loop exit
PB: predicated region body
PF: predicated region fallthrough
CT: control target
= control target key end

     0   :  { %12 = vsyncpa [#allocation3], 0  ;;  %s4968_s0 = inlined_call_operand.hbm [shape: bf16[48,784], index: 0, kind: input, shape index: {}]   ;;  %s4969_s1 = inlined_call_operand.hbm [shape: bf16[784,512], index: 1, kind: input, shape index: {}]   ;;  %s4970_s2 = inlined_call_operand.vmem [shape: f32[1,512], index: 2, kind: input, shape index: {}]   ;;  %s4971_s3 = inlined_call_operand.hbm [shape: bf16[512,512], index: 3, kind: input, shape index: {}]   ;;  %s4972_s4 = inlined_call_operand.vmem [shape: f32[1,512], index: 4, kind: input, shape index: {}]   ;;  %s4973_s5 = inlined_call_operand.hbm [shape: bf16[512,128], index: 5, kind: input, shape index: {}]   ;;  %s4974_s6 = inlined_call_operand.vmem [shape: f32[1,128], index: 6, kind: input, shape index: {}]   ;;  %s4975_s7 = inlined_call_operand.hbm [shape: f32[48,128], index: 7, kind: output, shape index: {}]  }
   0x1   :  { %13 = vsyncpa [#allocation6], 0 }
   0x2   :  { %14 = vsyncpa [#allocation9], 0 }
   0x3   :  { %15 = vsyncpa [#allocation4], 0  ;;  %s4716_s24 = smov [#allocation5]   ;;  %s4598_s28 = scalar_lea.hbm %s4969_s1, 25088 }
   0x4   :  { %s33_s25 = sshll.u32 %s4716_s24, 4  ;;  %p4599_p0 = scmp.ne.s32.totalorder %s4969_s1, %s4598_s28  ;;  %s34_s25 = int_to_ptr.vmem [resolvable:$true] %s33_s25 }
   0x5   :  { %p4602_p1 = scmp.lt.u32.totalorder %s4598_s28, %s4969_s1 }
   0x7   :  { %p4604_p2 = pnand %p4602_p1, %p4599_p0 }
   0x9   :  { %4607 = shalt.err (!%p4604_p2)
}
   0xa   :  { %s4608_s10 = scalar_lea.vmem %s34_s25, 25088  ;;  %p4613_p4 = scmp.lt.s32.totalorder %s34_s25, %s34_s25 }
   0xb   :  { %p4609_p3 = scmp.ne.s32.totalorder %s34_s25, %s4608_s10  ;;  %p4614_p5 = scmp.lt.s32.totalorder %s4608_s10, %s4608_s10 }
   0xd   :  { %p4615_p6 = por %p4614_p5, %p4613_p4 }
   0xf   :  { %p4616_p7 = pnand %p4615_p6, %p4609_p3 }
  0x11   :  { %4619 = shalt.err (!%p4616_p7)
}
  0x12   :  { %s4717_s11 = smov 256   ;;  %s4718_s12 = smov 16  }
  0x13   :  { %39 = dma.hbm_to_vmem [thread:$0]  %s4969_s1, 25088, %s34_s25, [#allocation6], %s4717_s11, %s4717_s11, %s4718_s12  }
  0x14   :  { %s4719_s15 = smov [#allocation2]   ;;  %s4620_s19 = scalar_lea.hbm %s4968_s0, 2688 }
  0x15   :  { %s21_s16 = sshll.u32 %s4719_s15, 4  ;;  %p4621_p8 = scmp.ne.s32.totalorder %s4968_s0, %s4620_s19  ;;  %s22_s16 = int_to_ptr.vmem [resolvable:$true] %s21_s16 }
  0x16   :  { %p4624_p9 = scmp.lt.u32.totalorder %s4620_s19, %s4968_s0 }
  0x18   :  { %p4626_p10 = pnand %p4624_p9, %p4621_p8 }
  0x1a   :  { %4629 = shalt.err (!%p4626_p10)
}
  0x1b   :  { %s4630_s24 = scalar_lea.vmem %s22_s16, 2688  ;;  %p4635_p12 = scmp.lt.s32.totalorder %s22_s16, %s22_s16 }
  0x1c   :  { %p4631_p11 = scmp.ne.s32.totalorder %s22_s16, %s4630_s24  ;;  %p4636_p13 = scmp.lt.s32.totalorder %s4630_s24, %s4630_s24 }
  0x1e   :  { %p4637_p0 = por %p4636_p13, %p4635_p12 }
  0x20   :  { %p4638_p1 = pnand %p4637_p0, %p4631_p11 }
  0x22   :  { %4641 = shalt.err (!%p4638_p1)
}
  0x23   :  { %s4720_s1 = smov 448   ;;  %s4721_s25 = smov 28  }
  0x24   :  { %27 = dma.hbm_to_vmem [thread:$0]  %s4968_s0, 2688, %s22_s16, [#allocation3], %s4720_s1, %s4720_s1, %s4721_s25  }
  0x25   :  { %s4722_s28 = smov [#allocation7]   ;;  %s4723_s30 = smov [#allocation8]  }
  0x26   :  { %s47_s29 = sshll.u32 %s4722_s28, 4  ;;  %s61_s8 = sshll.u32 %s4723_s30, 4  ;;  %s48_s29 = int_to_ptr.vmem [resolvable:$true] %s47_s29  ;;  %s4797_s8 = int_to_ptr.vmem [resolvable:$true] %s61_s8 }
  0x27   :  { %s4642_s13 = scalar_lea.hbm %s4971_s3, 16384 }
  0x28   :  { %p4643_p2 = scmp.ne.s32.totalorder %s4971_s3, %s4642_s13  ;;  %p4646_p3 = scmp.lt.u32.totalorder %s4642_s13, %s4971_s3 }
  0x2a   :  { %p4648_p4 = pnand %p4646_p3, %p4643_p2 }
  0x2c   :  { %4651 = shalt.err (!%p4648_p4)
}
  0x2d   :  { %s4652_s0 = scalar_lea.vmem %s48_s29, 16384  ;;  %p4657_p6 = scmp.lt.s32.totalorder %s48_s29, %s48_s29 }
  0x2e   :  { %p4653_p5 = scmp.ne.s32.totalorder %s48_s29, %s4652_s0  ;;  %p4658_p7 = scmp.lt.s32.totalorder %s4652_s0, %s4652_s0 }
  0x30   :  { %p4659_p8 = por %p4658_p7, %p4657_p6 }
  0x32   :  { %p4660_p9 = pnand %p4659_p8, %p4653_p5 }
  0x34   :  { %4663 = shalt.err (!%p4660_p9)
}
  0x35   :  { %53 = dma.hbm_to_vmem [thread:$0]  %s4971_s3, 16384, %s48_s29, [#allocation6], %s4717_s11, %s4717_s11, %s4718_s12  }
  0x36   :  { %s4664_s22 = scalar_lea.hbm %s4973_s5, 4096 }
  0x37   :  { %p4665_p10 = scmp.ne.s32.totalorder %s4973_s5, %s4664_s22  ;;  %p4668_p11 = scmp.lt.u32.totalorder %s4664_s22, %s4973_s5 }
  0x39   :  { %p4670_p12 = pnand %p4668_p11, %p4665_p10 }
  0x3b   :  { %4673 = shalt.err (!%p4670_p12)
}
  0x3c   :  { %s4674_s26 = scalar_lea.vmem %s4797_s8, 4096  ;;  %p4679_p0 = scmp.lt.s32.totalorder %s4797_s8, %s4797_s8 }
  0x3d   :  { %p4675_p13 = scmp.ne.s32.totalorder %s4797_s8, %s4674_s26  ;;  %p4680_p1 = scmp.lt.s32.totalorder %s4674_s26, %s4674_s26 }
  0x3f   :  { %p4681_p2 = por %p4680_p1, %p4679_p0 }
  0x41   :  { %p4682_p3 = pnand %p4681_p2, %p4675_p13 }
  0x43   :  { %4685 = shalt.err (!%p4682_p3)
}
  0x44   :  { %s4724_s3 = smov 64   ;;  %s4725_s11 = smov 4  }
  0x45   :  { %67 = dma.hbm_to_vmem [thread:$0]  %s4973_s5, 4096, %s4797_s8, [#allocation9], %s4724_s3, %s4724_s3, %s4725_s11  }
  0x46   :  { %4708 = dma.done.wait [#allocation3], 2688  }
  0x47   :  { %4709 = vsyncadd [#allocation3], 4294964608 }
  0x48   :  { %4710 = dma.done.wait [#allocation6], 41472  }
  0x49   :  { %4711 = vsyncadd [#allocation6], 4294925824 }
  0x4a   :  { %4712 = dma.done.wait [#allocation9], 4096  }
  0x4b   :  { %4713 = vsyncadd [#allocation9], 4294963200  ;;  %v4050_v0 = vld [vmem:[#allocation5 + $0x4] ss:$16 sps:$4 sm:$0xff]   ;;  %v4052_v1 = vld [vmem:[#allocation5 + $0xc] ss:$16 sps:$4 sm:$0xff]  }
  0x4c   :  { %1420 = vmatprep.subr.bf16.mxu0 %v4050_v0  ;;  %v4054_v2 = vld [vmem:[#allocation5] ss:$16 sps:$4 sm:$0xff]   ;;  %v4055_v3 = vld [vmem:[#allocation5 + $0x8] ss:$16 sps:$4 sm:$0xff]   ;;  %1672 = vmatprep.subr.bf16.mxu1 %v4052_v1  ;;  %v4056_v4 = vld [vmem:[#allocation5 + $0x24] ss:$16 sps:$4 sm:$0xff]  }
  0x4d   :  { %1421 = vmatpush1.bf16.msra.mxu0 %v4054_v2  ;;  %1673 = vmatpush1.bf16.msra.mxu1 %v4055_v3  ;;  %v4058_v5 = vld [vmem:[#allocation5 + $0x2c] ss:$16 sps:$4 sm:$0xff]   ;;  %v4060_v6 = vld [vmem:[#allocation5 + $0x20] ss:$16 sps:$4 sm:$0xff]   ;;  %v4061_v7 = vld [vmem:[#allocation5 + $0x28] ss:$16 sps:$4 sm:$0xff]  }
  0x4e   :  { %1422 = vmatprep.subr.bf16.mxu0 %v4056_v4  ;;  %1674 = vmatprep.subr.bf16.mxu1 %v4058_v5  ;;  %v4062_v8 = vld [vmem:[#allocation5 + $0x44] ss:$16 sps:$4 sm:$0xff]   ;;  %v4064_v9 = vld [vmem:[#allocation5 + $0x4c] ss:$16 sps:$4 sm:$0xff]   ;;  %v4066_v10 = vld [vmem:[#allocation5 + $0x40] ss:$16 sps:$4 sm:$0xff]  }
  0x4f   :  { %v4067_v11 = vld [vmem:[#allocation5 + $0x48] ss:$16 sps:$4 sm:$0xff]   ;;  %v4068_v12 = vld [vmem:[#allocation5 + $0x64] ss:$16 sps:$4 sm:$0xff]   ;;  %v4070_v13 = vld [vmem:[#allocation5 + $0x6c] ss:$16 sps:$4 sm:$0xff]  }
  0x50   :  { %v4072_v14 = vld [vmem:[#allocation5 + $0x60] ss:$16 sps:$4 sm:$0xff]   ;;  %v4073_v15 = vld [vmem:[#allocation5 + $0x68] ss:$16 sps:$4 sm:$0xff]   ;;  %v4074_v16 = vld [vmem:[#allocation5 + $0x84] ss:$16 sps:$4 sm:$0xff]  }
  0x51   :  { %1423 = vmatpush1.bf16.msra.mxu0 %v4060_v6  ;;  %1675 = vmatpush1.bf16.msra.mxu1 %v4061_v7  ;;  %v4076_v17 = vld [vmem:[#allocation5 + $0x8c] ss:$16 sps:$4 sm:$0xff]   ;;  %v4078_v18 = vld [vmem:[#allocation5 + $0x80] ss:$16 sps:$4 sm:$0xff]   ;;  %v4079_v19 = vld [vmem:[#allocation5 + $0x88] ss:$16 sps:$4 sm:$0xff]  }
  0x52   :  { %1424 = vmatprep.subr.bf16.mxu0 %v4062_v8  ;;  %1676 = vmatprep.subr.bf16.mxu1 %v4064_v9  ;;  %v4080_v20 = vld [vmem:[#allocation5 + $0xa4] ss:$16 sps:$4 sm:$0xff]   ;;  %v4082_v21 = vld [vmem:[#allocation5 + $0xac] ss:$16 sps:$4 sm:$0xff]   ;;  %v4084_v22 = vld [vmem:[#allocation5 + $0xa0] ss:$16 sps:$4 sm:$0xff]  }
  0x53   :  { %v4085_v23 = vld [vmem:[#allocation5 + $0xa8] ss:$16 sps:$4 sm:$0xff]   ;;  %v4086_v24 = vld [vmem:[#allocation5 + $0xc4] ss:$16 sps:$4 sm:$0xff]   ;;  %v4088_v25 = vld [vmem:[#allocation5 + $0xcc] ss:$16 sps:$4 sm:$0xff]  }
  0x54   :  { %v4090_v26 = vld [vmem:[#allocation5 + $0xc0] ss:$16 sps:$4 sm:$0xff]   ;;  %v4091_v27 = vld [vmem:[#allocation5 + $0xc8] ss:$16 sps:$4 sm:$0xff]   ;;  %v4092_v28 = vld [vmem:[#allocation5 + $0xe4] ss:$16 sps:$4 sm:$0xff]  }
  0x55   :  { %1425 = vmatpush1.bf16.msra.mxu0 %v4066_v10  ;;  %1677 = vmatpush1.bf16.msra.mxu1 %v4067_v11  ;;  %v4094_v29 = vld [vmem:[#allocation5 + $0xec] ss:$16 sps:$4 sm:$0xff]   ;;  %v4096_v30 = vld [vmem:[#allocation5 + $0xe0] ss:$16 sps:$4 sm:$0xff]   ;;  %v4097_v31 = vld [vmem:[#allocation5 + $0xe8] ss:$16 sps:$4 sm:$0xff]  }
  0x56   :  { %1426 = vmatprep.subr.bf16.mxu0 %v4068_v12  ;;  %1678 = vmatprep.subr.bf16.mxu1 %v4070_v13  ;;  %v4098_v32 = vld [vmem:[#allocation5 + $0x104] ss:$16 sps:$4 sm:$0xff]   ;;  %v4100_v33 = vld [vmem:[#allocation5 + $0x10c] ss:$16 sps:$4 sm:$0xff]   ;;  %v4102_v34 = vld [vmem:[#allocation5 + $0x100] ss:$16 sps:$4 sm:$0xff]  }
  0x57   :  { %v4103_v35 = vld [vmem:[#allocation5 + $0x108] ss:$16 sps:$4 sm:$0xff]   ;;  %v4104_v36 = vld [vmem:[#allocation5 + $0x124] ss:$16 sps:$4 sm:$0xff]   ;;  %v4106_v37 = vld [vmem:[#allocation5 + $0x12c] ss:$16 sps:$4 sm:$0xff]  }
  0x58   :  { %v4108_v38 = vld [vmem:[#allocation5 + $0x120] ss:$16 sps:$4 sm:$0xff]   ;;  %v4109_v39 = vld [vmem:[#allocation5 + $0x128] ss:$16 sps:$4 sm:$0xff]   ;;  %v4110_v40 = vld [vmem:[#allocation5 + $0x144] ss:$16 sps:$4 sm:$0xff]  }
  0x59   :  { %1427 = vmatpush1.bf16.msra.mxu0 %v4072_v14  ;;  %1679 = vmatpush1.bf16.msra.mxu1 %v4073_v15  ;;  %v4112_v41 = vld [vmem:[#allocation5 + $0x14c] ss:$16 sps:$4 sm:$0xff]   ;;  %v4114_v42 = vld [vmem:[#allocation5 + $0x140] ss:$16 sps:$4 sm:$0xff]   ;;  %v4115_v43 = vld [vmem:[#allocation5 + $0x148] ss:$16 sps:$4 sm:$0xff]  }
  0x5a   :  { %1428 = vmatprep.subr.bf16.mxu0 %v4074_v16  ;;  %1680 = vmatprep.subr.bf16.mxu1 %v4076_v17  ;;  %v4116_v44 = vld [vmem:[#allocation5 + $0x164] ss:$16 sps:$4 sm:$0xff]   ;;  %v4118_v45 = vld [vmem:[#allocation5 + $0x16c] ss:$16 sps:$4 sm:$0xff]   ;;  %v4120_v46 = vld [vmem:[#allocation5 + $0x160] ss:$16 sps:$4 sm:$0xff]  }
  0x5b   :  { %v4121_v47 = vld [vmem:[#allocation5 + $0x168] ss:$16 sps:$4 sm:$0xff]   ;;  %v4122_v49 = vld [vmem:[#allocation5 + $0x184] ss:$16 sps:$4 sm:$0xff]   ;;  %v4124_v50 = vld [vmem:[#allocation5 + $0x18c] ss:$16 sps:$4 sm:$0xff]  }
  0x5c   :  { %v4148_v48 = vld [vmem:[#allocation2 + $0x4] ss:$28 sps:$4 sm:$0xff]   ;;  %v4126_v51 = vld [vmem:[#allocation5 + $0x180] ss:$16 sps:$4 sm:$0xff]   ;;  %v4128_v53 = vld [vmem:[#allocation5 + $0x1a4] ss:$16 sps:$4 sm:$0xff]  }
  0x5d   :  { %1429 = vmatpush1.bf16.msra.mxu0 %v4078_v18  ;;  %1681 = vmatpush1.bf16.msra.mxu1 %v4079_v19  ;;  %v4127_v52 = vld [vmem:[#allocation5 + $0x188] ss:$16 sps:$4 sm:$0xff]   ;;  %v4130_v54 = vld [vmem:[#allocation5 + $0x1ac] ss:$16 sps:$4 sm:$0xff]   ;;  %v4132_v55 = vld [vmem:[#allocation5 + $0x1a0] ss:$16 sps:$4 sm:$0xff]  }
  0x5e   :  { %1430 = vmatprep.subr.bf16.mxu0 %v4080_v20  ;;  %1682 = vmatprep.subr.bf16.mxu1 %v4082_v21  ;;  %v4133_v56 = vld [vmem:[#allocation5 + $0x1a8] ss:$16 sps:$4 sm:$0xff]   ;;  %v4134_v57 = vld [vmem:[#allocation5 + $0x1c4] ss:$16 sps:$4 sm:$0xff]   ;;  %v4136_v58 = vld [vmem:[#allocation5 + $0x1cc] ss:$16 sps:$4 sm:$0xff]  }
  0x5f   :  { %1452 = vmatprep.mubr.bf16.mxu0 %v4148_v48  ;;  %1704 = vmatprep.mubr.bf16.mxu1 %v4148_v48  ;;  %v4138_v59 = vld [vmem:[#allocation5 + $0x1c0] ss:$16 sps:$4 sm:$0xff]   ;;  %v4139_v60 = vld [vmem:[#allocation5 + $0x1c8] ss:$16 sps:$4 sm:$0xff]   ;;  %v4140_v61 = vld [vmem:[#allocation5 + $0x1e4] ss:$16 sps:$4 sm:$0xff]  }
  0x60   :  { %v4142_v62 = vld [vmem:[#allocation5 + $0x1ec] ss:$16 sps:$4 sm:$0xff]   ;;  %v4144_v63 = vld [vmem:[#allocation5 + $0x1e0] ss:$16 sps:$4 sm:$0xff]   ;;  %v4145_v0 = vld [vmem:[#allocation5 + $0x1e8] ss:$16 sps:$4 sm:$0xff]  }
  0x61   :  { %1431 = vmatpush1.bf16.msra.mxu0 %v4084_v22  ;;  %1683 = vmatpush1.bf16.msra.mxu1 %v4085_v23  ;;  %v4151_v1 = vld [vmem:[#allocation5 + $0x204] ss:$16 sps:$4 sm:$0xff]   ;;  %v4154_v2 = vld [vmem:[#allocation5 + $0x20c] ss:$16 sps:$4 sm:$0xff]   ;;  %v4149_v4 = vld [vmem:[#allocation5 + $0x200] ss:$16 sps:$4 sm:$0xff]  }
  0x62   :  { %1432 = vmatprep.subr.bf16.mxu0 %v4086_v24  ;;  %1684 = vmatprep.subr.bf16.mxu1 %v4088_v25  ;;  %v4146_v3 = vld [vmem:[#allocation2] ss:$28 sps:$4 sm:$0xff]   ;;  %v4160_v7 = vld [vmem:[#allocation5 + $0x22c] ss:$16 sps:$4 sm:$0xff]   ;;  %v4155_v8 = vld [vmem:[#allocation5 + $0x220] ss:$16 sps:$4 sm:$0xff]  }
  0x63   :  { %v4152_v5 = vld [vmem:[#allocation5 + $0x208] ss:$16 sps:$4 sm:$0xff]   ;;  %v4157_v6 = vld [vmem:[#allocation5 + $0x224] ss:$16 sps:$4 sm:$0xff]   ;;  %v4166_v11 = vld [vmem:[#allocation5 + $0x24c] ss:$16 sps:$4 sm:$0xff]  }
  0x64   :  { %v4158_v9 = vld [vmem:[#allocation5 + $0x228] ss:$16 sps:$4 sm:$0xff]   ;;  %v4163_v10 = vld [vmem:[#allocation5 + $0x244] ss:$16 sps:$4 sm:$0xff]   ;;  %v4161_v12 = vld [vmem:[#allocation5 + $0x240] ss:$16 sps:$4 sm:$0xff]  }
  0x65   :  { %1433 = vmatpush1.bf16.msra.mxu0 %v4090_v26  ;;  %1685 = vmatpush1.bf16.msra.mxu1 %v4091_v27  ;;  %v4164_v13 = vld [vmem:[#allocation5 + $0x248] ss:$16 sps:$4 sm:$0xff]   ;;  %v4169_v14 = vld [vmem:[#allocation5 + $0x264] ss:$16 sps:$4 sm:$0xff]   ;;  %v4172_v15 = vld [vmem:[#allocation5 + $0x26c] ss:$16 sps:$4 sm:$0xff]  }
  0x66   :  { %1434 = vmatprep.subr.bf16.mxu0 %v4092_v28  ;;  %1686 = vmatprep.subr.bf16.mxu1 %v4094_v29  ;;  %v4167_v16 = vld [vmem:[#allocation5 + $0x260] ss:$16 sps:$4 sm:$0xff]   ;;  %v4170_v17 = vld [vmem:[#allocation5 + $0x268] ss:$16 sps:$4 sm:$0xff]   ;;  %v4175_v18 = vld [vmem:[#allocation5 + $0x284] ss:$16 sps:$4 sm:$0xff]  }
  0x67   :  { %v4221_v19 = vld [vmem:[#allocation2 + $0x3c] ss:$28 sps:$4 sm:$0xff]   ;;  %v4178_v20 = vld [vmem:[#allocation5 + $0x28c] ss:$16 sps:$4 sm:$0xff]   ;;  %v4176_v22 = vld [vmem:[#allocation5 + $0x288] ss:$16 sps:$4 sm:$0xff]  }
  0x68   :  { %v4173_v21 = vld [vmem:[#allocation5 + $0x280] ss:$16 sps:$4 sm:$0xff]   ;;  %v4181_v24 = vld [vmem:[#allocation5 + $0x2a4] ss:$16 sps:$4 sm:$0xff]   ;;  %v4184_v25 = vld [vmem:[#allocation5 + $0x2ac] ss:$16 sps:$4 sm:$0xff]  }
  0x69   :  { %1435 = vmatpush1.bf16.msra.mxu0 %v4096_v30  ;;  %1687 = vmatpush1.bf16.msra.mxu1 %v4097_v31  ;;  %v4229_v23 = vld [vmem:[#allocation2 + $0x38] ss:$28 sps:$4 sm:$0xff]   ;;  %v4182_v28 = vld [vmem:[#allocation5 + $0x2a8] ss:$16 sps:$4 sm:$0xff]   ;;  %v4187_v29 = vld [vmem:[#allocation5 + $0x2c4] ss:$16 sps:$4 sm:$0xff]  }
  0x6a   :  { %1436 = vmatprep.subr.bf16.mxu0 %v4098_v32  ;;  %1688 = vmatprep.subr.bf16.mxu1 %v4100_v33  ;;  %v4179_v26 = vld [vmem:[#allocation5 + $0x2a0] ss:$16 sps:$4 sm:$0xff]   ;;  %v4236_v27 = vld [vmem:[#allocation2 + $0x74] ss:$28 sps:$4 sm:$0xff]   ;;  %vm1410_vm0 = vcmask 130048  }
  0x6b   :  { %v4190_v30 = vld [vmem:[#allocation5 + $0x2cc] ss:$16 sps:$4 sm:$0xff]   ;;  %v4244_v31 = vld [vmem:[#allocation2 + $0x70] ss:$28 sps:$4 sm:$0xff]   ;;  %v4185_v32 = vld [vmem:[#allocation5 + $0x2c0] ss:$16 sps:$4 sm:$0xff]  }
  0x6c   :  { %v4188_v33 = vld [vmem:[#allocation5 + $0x2c8] ss:$16 sps:$4 sm:$0xff]   ;;  %v4214_v48 = vld [vmem:[#allocation5 + $0x34c] ss:$16 sps:$4 sm:$0xff]  }
  0x6d   :  { %1437 = vmatpush1.bf16.msra.mxu0 %v4102_v34  ;;  %1689 = vmatpush1.bf16.msra.mxu1 %v4103_v35  ;;  %v4193_v34 = vld [vmem:[#allocation5 + $0x2e4] ss:$16 sps:$4 sm:$0xff]   ;;  %v4196_v35 = vld [vmem:[#allocation5 + $0x2ec] ss:$16 sps:$4 sm:$0xff]  }
  0x6e   :  { %1438 = vmatprep.subr.bf16.mxu0 %v4104_v36  ;;  %1690 = vmatprep.subr.bf16.mxu1 %v4106_v37  ;;  %v4253_v36 = vld [vmem:[#allocation2 + $0xc] ss:$28 sps:$4 sm:$0xff]  }
  0x6f   :  { %v4191_v37 = vld [vmem:[#allocation5 + $0x2e0] ss:$16 sps:$4 sm:$0xff]  }
  0x71   :  { %1439 = vmatpush1.bf16.msra.mxu0 %v4108_v38  ;;  %1691 = vmatpush1.bf16.msra.mxu1 %v4109_v39  ;;  %v4194_v38 = vld [vmem:[#allocation5 + $0x2e8] ss:$16 sps:$4 sm:$0xff]   ;;  %v4199_v39 = vld [vmem:[#allocation5 + $0x304] ss:$16 sps:$4 sm:$0xff]  }
  0x72   :  { %1440 = vmatprep.subr.bf16.mxu0 %v4110_v40  ;;  %1692 = vmatprep.subr.bf16.mxu1 %v4112_v41  ;;  %v4202_v40 = vld [vmem:[#allocation5 + $0x30c] ss:$16 sps:$4 sm:$0xff]   ;;  %v4197_v41 = vld [vmem:[#allocation5 + $0x300] ss:$16 sps:$4 sm:$0xff]  }
  0x75   :  { %1441 = vmatpush1.bf16.msra.mxu0 %v4114_v42  ;;  %1693 = vmatpush1.bf16.msra.mxu1 %v4115_v43  ;;  %v4200_v42 = vld [vmem:[#allocation5 + $0x308] ss:$16 sps:$4 sm:$0xff]   ;;  %v4205_v43 = vld [vmem:[#allocation5 + $0x324] ss:$16 sps:$4 sm:$0xff]  }
  0x76   :  { %1442 = vmatprep.subr.bf16.mxu0 %v4116_v44  ;;  %1694 = vmatprep.subr.bf16.mxu1 %v4118_v45  ;;  %v4208_v44 = vld [vmem:[#allocation5 + $0x32c] ss:$16 sps:$4 sm:$0xff]   ;;  %v4203_v45 = vld [vmem:[#allocation5 + $0x320] ss:$16 sps:$4 sm:$0xff]  }
  0x79   :  { %1443 = vmatpush1.bf16.msra.mxu0 %v4120_v46  ;;  %1695 = vmatpush1.bf16.msra.mxu1 %v4121_v47  ;;  %v4206_v46 = vld [vmem:[#allocation5 + $0x328] ss:$16 sps:$4 sm:$0xff]   ;;  %v4211_v47 = vld [vmem:[#allocation5 + $0x344] ss:$16 sps:$4 sm:$0xff]  }
  0x7a   :  { %1444 = vmatprep.subr.bf16.mxu0 %v4122_v49  ;;  %1696 = vmatprep.subr.bf16.mxu1 %v4124_v50  ;;  %v4209_v49 = vld [vmem:[#allocation5 + $0x340] ss:$16 sps:$4 sm:$0xff]   ;;  %v4212_v50 = vld [vmem:[#allocation5 + $0x348] ss:$16 sps:$4 sm:$0xff]  }
  0x7d   :  { %1445 = vmatpush1.bf16.msra.mxu0 %v4126_v51  ;;  %1697 = vmatpush1.bf16.msra.mxu1 %v4127_v52  ;;  %v4217_v51 = vld [vmem:[#allocation5 + $0x364] ss:$16 sps:$4 sm:$0xff]   ;;  %v4220_v52 = vld [vmem:[#allocation5 + $0x36c] ss:$16 sps:$4 sm:$0xff]  }
  0x7e   :  { %1446 = vmatprep.subr.bf16.mxu0 %v4128_v53  ;;  %1698 = vmatprep.subr.bf16.mxu1 %v4130_v54  ;;  %v4215_v53 = vld [vmem:[#allocation5 + $0x360] ss:$16 sps:$4 sm:$0xff]   ;;  %v4218_v54 = vld [vmem:[#allocation5 + $0x368] ss:$16 sps:$4 sm:$0xff]  }
  0x81   :  { %1447 = vmatpush1.bf16.msra.mxu0 %v4132_v55  ;;  %1699 = vmatpush1.bf16.msra.mxu1 %v4133_v56  ;;  %v4225_v55 = vld [vmem:[#allocation5 + $0x384] ss:$16 sps:$4 sm:$0xff]   ;;  %v4228_v56 = vld [vmem:[#allocation5 + $0x38c] ss:$16 sps:$4 sm:$0xff]  }
  0x82   :  { %1448 = vmatprep.subr.bf16.mxu0 %v4134_v57  ;;  %1700 = vmatprep.subr.bf16.mxu1 %v4136_v58  ;;  %v4223_v57 = vld [vmem:[#allocation5 + $0x380] ss:$16 sps:$4 sm:$0xff]   ;;  %v4226_v58 = vld [vmem:[#allocation5 + $0x388] ss:$16 sps:$4 sm:$0xff]  }
  0x85   :  { %1449 = vmatpush1.bf16.msra.mxu0 %v4138_v59  ;;  %1701 = vmatpush1.bf16.msra.mxu1 %v4139_v60  ;;  %v4232_v59 = vld [vmem:[#allocation5 + $0x3a4] ss:$16 sps:$4 sm:$0xff]   ;;  %v4235_v60 = vld [vmem:[#allocation5 + $0x3ac] ss:$16 sps:$4 sm:$0xff]  }
  0x86   :  { %1450 = vmatprep.subr.bf16.mxu0 %v4140_v61  ;;  %1702 = vmatprep.subr.bf16.mxu1 %v4142_v62  ;;  %v4230_v61 = vld [vmem:[#allocation5 + $0x3a0] ss:$16 sps:$4 sm:$0xff]   ;;  %v4233_v62 = vld [vmem:[#allocation5 + $0x3a8] ss:$16 sps:$4 sm:$0xff]  }
  0x89   :  { %1451 = vmatpush1.bf16.msra.mxu0 %v4144_v63  ;;  %1703 = vmatpush1.bf16.msra.mxu1 %v4145_v0  ;;  %v4240_v63 = vld [vmem:[#allocation5 + $0x3c4] ss:$16 sps:$4 sm:$0xff]   ;;  %v4243_v0 = vld [vmem:[#allocation5 + $0x3cc] ss:$16 sps:$4 sm:$0xff]  }
  0x8a   :  { %1483 = vmatprep.subr.bf16.mxu0 %v4151_v1  ;;  %1735 = vmatprep.subr.bf16.mxu1 %v4154_v2  ;;  %v4238_v1 = vld [vmem:[#allocation5 + $0x3c0] ss:$16 sps:$4 sm:$0xff]   ;;  %v4241_v2 = vld [vmem:[#allocation5 + $0x3c8] ss:$16 sps:$4 sm:$0xff]  }
  0x8c   :  { %1453 = vmatmul.mubr.bf16.vlgmr.msra.gmra.mrb[0].mxu0 %v4146_v3  ;;  %1705 = vmatmul.mubr.bf16.vlgmr.msra.gmra.mrb[0].mxu1 %v4146_v3  ;;  %v4247_v3 = vld [vmem:[#allocation5 + $0x3e4] ss:$16 sps:$4 sm:$0xff]  }
  0x8d   :  { %1484 = vmatpush1.bf16.msra.mxu0 %v4149_v4  ;;  %1736 = vmatpush1.bf16.msra.mxu1 %v4152_v5  ;;  %v4250_v4 = vld [vmem:[#allocation5 + $0x3ec] ss:$16 sps:$4 sm:$0xff]   ;;  %v4245_v5 = vld [vmem:[#allocation5 + $0x3e0] ss:$16 sps:$4 sm:$0xff]  }
  0x8e   :  { %1485 = vmatprep.subr.bf16.mxu0 %v4157_v6  ;;  %1737 = vmatprep.subr.bf16.mxu1 %v4160_v7  ;;  %v4248_v6 = vld [vmem:[#allocation5 + $0x3e8] ss:$16 sps:$4 sm:$0xff]   ;;  %v4256_v7 = vld [vmem:[#allocation5 + $0x404] ss:$16 sps:$4 sm:$0xff]  }
  0x8f   :  { %1462 = vmatprep.mubr.bf16.mxu0 %v4221_v19  ;;  %1714 = vmatprep.mubr.bf16.mxu1 %v4221_v19  ;;  %v4266_v19 = vld [vmem:[#allocation5 + $0x440] ss:$16 sps:$4 sm:$0xff]  }
  0x91   :  { %1486 = vmatpush1.bf16.msra.mxu0 %v4155_v8  ;;  %1738 = vmatpush1.bf16.msra.mxu1 %v4158_v9  ;;  %v4259_v8 = vld [vmem:[#allocation5 + $0x40c] ss:$16 sps:$4 sm:$0xff]  }
  0x92   :  { %1487 = vmatprep.subr.bf16.mxu0 %v4163_v10  ;;  %1739 = vmatprep.subr.bf16.mxu1 %v4166_v11  ;;  %v4251_v9 = vld [vmem:[#allocation2 + $0x8] ss:$28 sps:$4 sm:$0xff]   ;;  %v4257_v11 = vld [vmem:[#allocation5 + $0x408] ss:$16 sps:$4 sm:$0xff]  }
  0x93   :  { %v4254_v10 = vld [vmem:[#allocation5 + $0x400] ss:$16 sps:$4 sm:$0xff]  }
  0x94   :  { %1463 = vmatmul.mubr.bf16.gmra.mrb[4].mxu0 %v4229_v23  ;;  %1715 = vmatmul.mubr.bf16.gmra.mrb[4].mxu1 %v4229_v23  ;;  %v4277_v23 = vld [vmem:[#allocation5 + $0x46c] ss:$16 sps:$4 sm:$0xff]  }
  0x95   :  { %1488 = vmatpush1.bf16.msra.mxu0 %v4161_v12  ;;  %1740 = vmatpush1.bf16.msra.mxu1 %v4164_v13  ;;  %v4262_v12 = vld [vmem:[#allocation5 + $0x424] ss:$16 sps:$4 sm:$0xff]   ;;  %v4265_v13 = vld [vmem:[#allocation5 + $0x42c] ss:$16 sps:$4 sm:$0xff]  }
  0x96   :  { %1489 = vmatprep.subr.bf16.mxu0 %v4169_v14  ;;  %1741 = vmatprep.subr.bf16.mxu1 %v4172_v15  ;;  %v4326_v14 = vld [vmem:[#allocation2 + $0x44] ss:$28 sps:$4 sm:$0xff]   ;;  %v4260_v15 = vld [vmem:[#allocation5 + $0x420] ss:$16 sps:$4 sm:$0xff]  }
  0x97   :  { %1472 = vmatprep.mubr.bf16.mxu0 %v4236_v27  ;;  %1724 = vmatprep.mubr.bf16.mxu1 %v4236_v27  ;;  %v4280_v27 = vld [vmem:[#allocation5 + $0x484] ss:$16 sps:$4 sm:$0xff]  }
  0x99   :  { %1490 = vmatpush1.bf16.msra.mxu0 %v4167_v16  ;;  %1742 = vmatpush1.bf16.msra.mxu1 %v4170_v17  ;;  %v4263_v16 = vld [vmem:[#allocation5 + $0x428] ss:$16 sps:$4 sm:$0xff]   ;;  %v4268_v17 = vld [vmem:[#allocation5 + $0x444] ss:$16 sps:$4 sm:$0xff]  }
  0x9a   :  { %1491 = vmatprep.subr.bf16.mxu0 %v4175_v18  ;;  %1743 = vmatprep.subr.bf16.mxu1 %v4178_v20  ;;  %v4271_v18 = vld [vmem:[#allocation5 + $0x44c] ss:$16 sps:$4 sm:$0xff]   ;;  %v4269_v20 = vld [vmem:[#allocation5 + $0x448] ss:$16 sps:$4 sm:$0xff]  }
  0x9c   :  { %1473 = vmatmul.mubr.bf16.gmra.mrb[8].mxu0 %v4244_v31  ;;  %1725 = vmatmul.mubr.bf16.gmra.mrb[8].mxu1 %v4244_v31  ;;  %v4343_v31 = vld [vmem:[#allocation2 + $0x78] ss:$28 sps:$4 sm:$0xff]  }
  0x9d   :  { %1492 = vmatpush1.bf16.msra.mxu0 %v4173_v21  ;;  %1744 = vmatpush1.bf16.msra.mxu1 %v4176_v22  ;;  %v4328_v21 = vld [vmem:[#allocation2 + $0x40] ss:$28 sps:$4 sm:$0xff]  }
  0x9e   :  { %1493 = vmatprep.subr.bf16.mxu0 %v4181_v24  ;;  %1745 = vmatprep.subr.bf16.mxu1 %v4184_v25  ;;  %v4274_v22 = vld [vmem:[#allocation5 + $0x464] ss:$16 sps:$4 sm:$0xff]   ;;  %v4272_v25 = vld [vmem:[#allocation5 + $0x460] ss:$16 sps:$4 sm:$0xff]  }
  0x9f   :  { %1515 = vmatprep.mubr.bf16.mxu0 %v4253_v36  ;;  %1767 = vmatprep.mubr.bf16.mxu1 %v4253_v36  ;;  %v4341_v24 = vld [vmem:[#allocation2 + $0x7c] ss:$28 sps:$4 sm:$0xff]   ;;  %v4287_v36 = vld [vmem:[#allocation5 + $0x4a8] ss:$16 sps:$4 sm:$0xff]  }
  0xa1   :  { %1494 = vmatpush1.bf16.msra.mxu0 %v4179_v26  ;;  %1746 = vmatpush1.bf16.msra.mxu1 %v4182_v28  ;;  %v4275_v26 = vld [vmem:[#allocation5 + $0x468] ss:$16 sps:$4 sm:$0xff]   ;;  %v4283_v28 = vld [vmem:[#allocation5 + $0x48c] ss:$16 sps:$4 sm:$0xff]  }
  0xa2   :  { %1495 = vmatprep.subr.bf16.mxu0 %v4187_v29  ;;  %1747 = vmatprep.subr.bf16.mxu1 %v4190_v30  ;;  %v4278_v29 = vld [vmem:[#allocation5 + $0x480] ss:$16 sps:$4 sm:$0xff]   ;;  %v4281_v30 = vld [vmem:[#allocation5 + $0x488] ss:$16 sps:$4 sm:$0xff]  }
  0xa5   :  { %1496 = vmatpush1.bf16.msra.mxu0 %v4185_v32  ;;  %1748 = vmatpush1.bf16.msra.mxu1 %v4188_v33  ;;  %v4286_v32 = vld [vmem:[#allocation5 + $0x4a4] ss:$16 sps:$4 sm:$0xff]   ;;  %v4289_v33 = vld [vmem:[#allocation5 + $0x4ac] ss:$16 sps:$4 sm:$0xff]  }
  0xa6   :  { %1497 = vmatprep.subr.bf16.mxu0 %v4193_v34  ;;  %1749 = vmatprep.subr.bf16.mxu1 %v4196_v35  ;;  %v4358_v34 = vld [vmem:[#allocation2 + $0x14] ss:$28 sps:$4 sm:$0xff]   ;;  %v4284_v35 = vld [vmem:[#allocation5 + $0x4a0] ss:$16 sps:$4 sm:$0xff]  }
  0xa9   :  { %1498 = vmatpush1.bf16.msra.mxu0 %v4191_v37  ;;  %1750 = vmatpush1.bf16.msra.mxu1 %v4194_v38  ;;  %v4292_v37 = vld [vmem:[#allocation5 + $0x4c4] ss:$16 sps:$4 sm:$0xff]   ;;  %v4295_v38 = vld [vmem:[#allocation5 + $0x4cc] ss:$16 sps:$4 sm:$0xff]  }
  0xaa   :  { %1499 = vmatprep.subr.bf16.mxu0 %v4199_v39  ;;  %1751 = vmatprep.subr.bf16.mxu1 %v4202_v40  ;;  %v4290_v39 = vld [vmem:[#allocation5 + $0x4c0] ss:$16 sps:$4 sm:$0xff]   ;;  %v4293_v40 = vld [vmem:[#allocation5 + $0x4c8] ss:$16 sps:$4 sm:$0xff]  }
  0xad   :  { %1500 = vmatpush1.bf16.msra.mxu0 %v4197_v41  ;;  %1752 = vmatpush1.bf16.msra.mxu1 %v4200_v42  ;;  %v4298_v41 = vld [vmem:[#allocation5 + $0x4e4] ss:$16 sps:$4 sm:$0xff]   ;;  %v4301_v42 = vld [vmem:[#allocation5 + $0x4ec] ss:$16 sps:$4 sm:$0xff]  }
  0xae   :  { %1501 = vmatprep.subr.bf16.mxu0 %v4205_v43  ;;  %1753 = vmatprep.subr.bf16.mxu1 %v4208_v44  ;;  %v4296_v43 = vld [vmem:[#allocation5 + $0x4e0] ss:$16 sps:$4 sm:$0xff]   ;;  %v4299_v44 = vld [vmem:[#allocation5 + $0x4e8] ss:$16 sps:$4 sm:$0xff]  }
  0xb1   :  { %1502 = vmatpush1.bf16.msra.mxu0 %v4203_v45  ;;  %1754 = vmatpush1.bf16.msra.mxu1 %v4206_v46  ;;  %v4304_v45 = vld [vmem:[#allocation5 + $0x504] ss:$16 sps:$4 sm:$0xff]   ;;  %v4307_v46 = vld [vmem:[#allocation5 + $0x50c] ss:$16 sps:$4 sm:$0xff]  }
  0xb2   :  { %1503 = vmatprep.subr.bf16.mxu0 %v4211_v47  ;;  %1755 = vmatprep.subr.bf16.mxu1 %v4214_v48  ;;  %v4302_v47 = vld [vmem:[#allocation5 + $0x500] ss:$16 sps:$4 sm:$0xff]   ;;  %v4305_v48 = vld [vmem:[#allocation5 + $0x508] ss:$16 sps:$4 sm:$0xff]  }
  0xb5   :  { %1504 = vmatpush1.bf16.msra.mxu0 %v4209_v49  ;;  %1756 = vmatpush1.bf16.msra.mxu1 %v4212_v50  ;;  %v4310_v49 = vld [vmem:[#allocation5 + $0x524] ss:$16 sps:$4 sm:$0xff]   ;;  %v4313_v50 = vld [vmem:[#allocation5 + $0x52c] ss:$16 sps:$4 sm:$0xff]  }
  0xb6   :  { %1505 = vmatprep.subr.bf16.mxu0 %v4217_v51  ;;  %1757 = vmatprep.subr.bf16.mxu1 %v4220_v52  ;;  %v4308_v51 = vld [vmem:[#allocation5 + $0x520] ss:$16 sps:$4 sm:$0xff]   ;;  %v4311_v52 = vld [vmem:[#allocation5 + $0x528] ss:$16 sps:$4 sm:$0xff]  }
  0xb9   :  { %1506 = vmatpush1.bf16.msra.mxu0 %v4215_v53  ;;  %1758 = vmatpush1.bf16.msra.mxu1 %v4218_v54  ;;  %v4316_v53 = vld [vmem:[#allocation5 + $0x544] ss:$16 sps:$4 sm:$0xff]   ;;  %v4319_v54 = vld [vmem:[#allocation5 + $0x54c] ss:$16 sps:$4 sm:$0xff]  }
  0xba   :  { %1507 = vmatprep.subr.bf16.mxu0 %v4225_v55  ;;  %1759 = vmatprep.subr.bf16.mxu1 %v4228_v56  ;;  %v4314_v55 = vld [vmem:[#allocation5 + $0x540] ss:$16 sps:$4 sm:$0xff]   ;;  %v4317_v56 = vld [vmem:[#allocation5 + $0x548] ss:$16 sps:$4 sm:$0xff]  }
  0xbd   :  { %1508 = vmatpush1.bf16.msra.mxu0 %v4223_v57  ;;  %1760 = vmatpush1.bf16.msra.mxu1 %v4226_v58  ;;  %v4322_v57 = vld [vmem:[#allocation5 + $0x564] ss:$16 sps:$4 sm:$0xff]   ;;  %v4325_v58 = vld [vmem:[#allocation5 + $0x56c] ss:$16 sps:$4 sm:$0xff]  }
  0xbe   :  { %1509 = vmatprep.subr.bf16.mxu0 %v4232_v59  ;;  %1761 = vmatprep.subr.bf16.mxu1 %v4235_v60  ;;  %v4320_v59 = vld [vmem:[#allocation5 + $0x560] ss:$16 sps:$4 sm:$0xff]   ;;  %v4323_v60 = vld [vmem:[#allocation5 + $0x568] ss:$16 sps:$4 sm:$0xff]  }
  0xc1   :  { %1510 = vmatpush1.bf16.msra.mxu0 %v4230_v61  ;;  %1762 = vmatpush1.bf16.msra.mxu1 %v4233_v62  ;;  %v4331_v61 = vld [vmem:[#allocation5 + $0x584] ss:$16 sps:$4 sm:$0xff]   ;;  %v4334_v62 = vld [vmem:[#allocation5 + $0x58c] ss:$16 sps:$4 sm:$0xff]  }
  0xc2   :  { %1511 = vmatprep.subr.bf16.mxu0 %v4240_v63  ;;  %1763 = vmatprep.subr.bf16.mxu1 %v4243_v0  ;;  %v4329_v63 = vld [vmem:[#allocation5 + $0x580] ss:$16 sps:$4 sm:$0xff]   ;;  %v4332_v0 = vld [vmem:[#allocation5 + $0x588] ss:$16 sps:$4 sm:$0xff]  }
  0xc5   :  { %1512 = vmatpush1.bf16.msra.mxu0 %v4238_v1  ;;  %1764 = vmatpush1.bf16.msra.mxu1 %v4241_v2  ;;  %v4337_v1 = vld [vmem:[#allocation5 + $0x5a4] ss:$16 sps:$4 sm:$0xff]   ;;  %v4340_v2 = vld [vmem:[#allocation5 + $0x5ac] ss:$16 sps:$4 sm:$0xff]  }
  0xc6   :  { %1513 = vmatprep.subr.bf16.mxu0 %v4247_v3  ;;  %1765 = vmatprep.subr.bf16.mxu1 %v4250_v4  ;;  %v4335_v3 = vld [vmem:[#allocation5 + $0x5a0] ss:$16 sps:$4 sm:$0xff]   ;;  %v4338_v4 = vld [vmem:[#allocation5 + $0x5a8] ss:$16 sps:$4 sm:$0xff]  }
  0xc9   :  { %1514 = vmatpush1.bf16.msra.mxu0 %v4245_v5  ;;  %1766 = vmatpush1.bf16.msra.mxu1 %v4248_v6  ;;  %v4346_v5 = vld [vmem:[#allocation5 + $0x5c4] ss:$16 sps:$4 sm:$0xff]   ;;  %v4349_v6 = vld [vmem:[#allocation5 + $0x5cc] ss:$16 sps:$4 sm:$0xff]  }
  0xca   :  { %1546 = vmatprep.subr.bf16.mxu0 %v4256_v7  ;;  %1798 = vmatprep.subr.bf16.mxu1 %v4259_v8  ;;  %v4344_v7 = vld [vmem:[#allocation5 + $0x5c0] ss:$16 sps:$4 sm:$0xff]   ;;  %v4347_v8 = vld [vmem:[#allocation5 + $0x5c8] ss:$16 sps:$4 sm:$0xff]  }
  0xcc   :  { %1516 = vmatmul.mubr.bf16.vlgmr.msra.gmra.mrb[0].mxu0 %v4251_v9  ;;  %1768 = vmatmul.mubr.bf16.vlgmr.msra.gmra.mrb[0].mxu1 %v4251_v9  ;;  %v4352_v9 = vld [vmem:[#allocation5 + $0x5e4] ss:$16 sps:$4 sm:$0xff]  }
  0xcd   :  { %1547 = vmatpush1.bf16.msra.mxu0 %v4254_v10  ;;  %1799 = vmatpush1.bf16.msra.mxu1 %v4257_v11  ;;  %v4355_v10 = vld [vmem:[#allocation5 + $0x5ec] ss:$16 sps:$4 sm:$0xff]   ;;  %v4350_v11 = vld [vmem:[#allocation5 + $0x5e0] ss:$16 sps:$4 sm:$0xff]  }
  0xce   :  { %1548 = vmatprep.subr.bf16.mxu0 %v4262_v12  ;;  %1800 = vmatprep.subr.bf16.mxu1 %v4265_v13  ;;  %v4353_v12 = vld [vmem:[#allocation5 + $0x5e8] ss:$16 sps:$4 sm:$0xff]   ;;  %v4361_v13 = vld [vmem:[#allocation5 + $0x604] ss:$16 sps:$4 sm:$0xff]  }
  0xcf   :  { %1525 = vmatprep.mubr.bf16.mxu0 %v4326_v14  ;;  %1777 = vmatprep.mubr.bf16.mxu1 %v4326_v14  ;;  %v4370_v14 = vld [vmem:[#allocation5 + $0x60c] ss:$16 sps:$4 sm:$0xff]  }
  0xd1   :  { %1549 = vmatpush1.bf16.msra.mxu0 %v4260_v15  ;;  %1801 = vmatpush1.bf16.msra.mxu1 %v4263_v16  ;;  %v4356_v15 = vld [vmem:[#allocation2 + $0x10] ss:$28 sps:$4 sm:$0xff]   ;;  %v4359_v16 = vld [vmem:[#allocation5 + $0x600] ss:$16 sps:$4 sm:$0xff]  }
  0xd2   :  { %1550 = vmatprep.subr.bf16.mxu0 %v4268_v17  ;;  %1802 = vmatprep.subr.bf16.mxu1 %v4271_v18  ;;  %v4362_v17 = vld [vmem:[#allocation2 + $0x4c] ss:$28 sps:$4 sm:$0xff]   ;;  %v4368_v18 = vld [vmem:[#allocation5 + $0x608] ss:$16 sps:$4 sm:$0xff]  }
  0xd4   :  { %1526 = vmatmul.mubr.bf16.gmra.mrb[4].mxu0 %v4328_v21  ;;  %1778 = vmatmul.mubr.bf16.gmra.mrb[4].mxu1 %v4328_v21  ;;  %v4364_v21 = vld [vmem:[#allocation2 + $0x48] ss:$28 sps:$4 sm:$0xff]  }
  0xd5   :  { %1551 = vmatpush1.bf16.msra.mxu0 %v4266_v19  ;;  %1803 = vmatpush1.bf16.msra.mxu1 %v4269_v20  ;;  %v4376_v19 = vld [vmem:[#allocation7 + $0x4] ss:$16 sps:$4 sm:$0xff]   ;;  %v4379_v20 = vld [vmem:[#allocation7 + $0xc] ss:$16 sps:$4 sm:$0xff]  }
  0xd6   :  { %1552 = vmatprep.subr.bf16.mxu0 %v4274_v22  ;;  %1804 = vmatprep.subr.bf16.mxu1 %v4277_v23  ;;  %v4365_v22 = vld [vmem:[#allocation2 + $0x84] ss:$28 sps:$4 sm:$0xff]  }
  0xd7   :  { %1535 = vmatprep.mubr.bf16.mxu0 %v4341_v24  ;;  %1787 = vmatprep.mubr.bf16.mxu1 %v4341_v24  ;;  %v4367_v23 = vld [vmem:[#allocation2 + $0x80] ss:$28 sps:$4 sm:$0xff]   ;;  %v4726_v24 = vmov 0  }
  0xd9   :  { %1553 = vmatpush1.bf16.msra.mxu0 %v4272_v25  ;;  %1805 = vmatpush1.bf16.msra.mxu1 %v4275_v26  ;;  %v4371_v25 = vld [vmem:[#allocation2 + $0x18] ss:$28 sps:$4 sm:$0xff]  }
  0xda   :  { %1554 = vmatprep.subr.bf16.mxu0 %v4280_v27  ;;  %1806 = vmatprep.subr.bf16.mxu1 %v4283_v28  ;;  %v4374_v26 = vld [vmem:[#allocation7] ss:$16 sps:$4 sm:$0xff]   ;;  %v4377_v27 = vld [vmem:[#allocation7 + $0x8] ss:$16 sps:$4 sm:$0xff]   ;;  %v4382_v28 = vld [vmem:[#allocation7 + $0x24] ss:$16 sps:$4 sm:$0xff]  }
  0xdc   :  { %1536 = vmatmul.mubr.bf16.gmra.mrb[8].mxu0 %v4343_v31  ;;  %1788 = vmatmul.mubr.bf16.gmra.mrb[8].mxu1 %v4343_v31  ;;  %v4383_v31 = vld [vmem:[#allocation7 + $0x28] ss:$16 sps:$4 sm:$0xff]  }
  0xdd   :  { %1555 = vmatpush1.bf16.msra.mxu0 %v4278_v29  ;;  %1807 = vmatpush1.bf16.msra.mxu1 %v4281_v30  ;;  %v4385_v29 = vld [vmem:[#allocation7 + $0x2c] ss:$16 sps:$4 sm:$0xff]   ;;  %v4380_v30 = vld [vmem:[#allocation7 + $0x20] ss:$16 sps:$4 sm:$0xff]  }
  0xde   :  { %1556 = vmatprep.subr.bf16.mxu0 %v4286_v32  ;;  %1808 = vmatprep.subr.bf16.mxu1 %v4289_v33  ;;  %v4388_v32 = vld [vmem:[#allocation7 + $0x44] ss:$16 sps:$4 sm:$0xff]   ;;  %v4391_v33 = vld [vmem:[#allocation7 + $0x4c] ss:$16 sps:$4 sm:$0xff]  }
  0xdf   :  { %1578 = vmatprep.mubr.bf16.mxu0 %v4358_v34  ;;  %1830 = vmatprep.mubr.bf16.mxu1 %v4358_v34  ;;  %v4372_v34 = vld [vmem:[#allocation2 + $0x50] ss:$28 sps:$4 sm:$0xff]  }
  0xe1   :  { %1557 = vmatpush1.bf16.msra.mxu0 %v4284_v35  ;;  %1809 = vmatpush1.bf16.msra.mxu1 %v4287_v36  ;;  %v4386_v35 = vld [vmem:[#allocation7 + $0x40] ss:$16 sps:$4 sm:$0xff]   ;;  %v4389_v36 = vld [vmem:[#allocation7 + $0x48] ss:$16 sps:$4 sm:$0xff]  }
  0xe2   :  { %1558 = vmatprep.subr.bf16.mxu0 %v4292_v37  ;;  %1810 = vmatprep.subr.bf16.mxu1 %v4295_v38  ;;  %v4394_v37 = vld [vmem:[#allocation7 + $0x64] ss:$16 sps:$4 sm:$0xff]   ;;  %v4397_v38 = vld [vmem:[#allocation7 + $0x6c] ss:$16 sps:$4 sm:$0xff]  }
  0xe5   :  { %1559 = vmatpush1.bf16.msra.mxu0 %v4290_v39  ;;  %1811 = vmatpush1.bf16.msra.mxu1 %v4293_v40  ;;  %v4392_v39 = vld [vmem:[#allocation7 + $0x60] ss:$16 sps:$4 sm:$0xff]   ;;  %v4395_v40 = vld [vmem:[#allocation7 + $0x68] ss:$16 sps:$4 sm:$0xff]  }
  0xe6   :  { %1560 = vmatprep.subr.bf16.mxu0 %v4298_v41  ;;  %1812 = vmatprep.subr.bf16.mxu1 %v4301_v42  ;;  %v4400_v41 = vld [vmem:[#allocation7 + $0x84] ss:$16 sps:$4 sm:$0xff]   ;;  %v4403_v42 = vld [vmem:[#allocation7 + $0x8c] ss:$16 sps:$4 sm:$0xff]  }
  0xe9   :  { %1561 = vmatpush1.bf16.msra.mxu0 %v4296_v43  ;;  %1813 = vmatpush1.bf16.msra.mxu1 %v4299_v44  ;;  %v4373_v43 = vld [vmem:[#allocation2 + $0x88] ss:$28 sps:$4 sm:$0xff]  }
  0xea   :  { %1562 = vmatprep.subr.bf16.mxu0 %v4304_v45  ;;  %1814 = vmatprep.subr.bf16.mxu1 %v4307_v46  ;;  %v4398_v44 = vld [vmem:[#allocation7 + $0x80] ss:$16 sps:$4 sm:$0xff]   ;;  %v4401_v45 = vld [vmem:[#allocation7 + $0x88] ss:$16 sps:$4 sm:$0xff]   ;;  %v4406_v46 = vld [vmem:[#allocation7 + $0xa4] ss:$16 sps:$4 sm:$0xff]  }
  0xed   :  { %1563 = vmatpush1.bf16.msra.mxu0 %v4302_v47  ;;  %1815 = vmatpush1.bf16.msra.mxu1 %v4305_v48  ;;  %v4409_v47 = vld [vmem:[#allocation7 + $0xac] ss:$16 sps:$4 sm:$0xff]   ;;  %v4404_v48 = vld [vmem:[#allocation7 + $0xa0] ss:$16 sps:$4 sm:$0xff]  }
  0xee   :  { %1564 = vmatprep.subr.bf16.mxu0 %v4310_v49  ;;  %1816 = vmatprep.subr.bf16.mxu1 %v4313_v50  ;;  %v4407_v49 = vld [vmem:[#allocation7 + $0xa8] ss:$16 sps:$4 sm:$0xff]   ;;  %v4412_v50 = vld [vmem:[#allocation7 + $0xc4] ss:$16 sps:$4 sm:$0xff]  }
  0xf1   :  { %1565 = vmatpush1.bf16.msra.mxu0 %v4308_v51  ;;  %1817 = vmatpush1.bf16.msra.mxu1 %v4311_v52  ;;  %v4415_v51 = vld [vmem:[#allocation7 + $0xcc] ss:$16 sps:$4 sm:$0xff]   ;;  %v4410_v52 = vld [vmem:[#allocation7 + $0xc0] ss:$16 sps:$4 sm:$0xff]  }
  0xf2   :  { %1566 = vmatprep.subr.bf16.mxu0 %v4316_v53  ;;  %1818 = vmatprep.subr.bf16.mxu1 %v4319_v54  ;;  %v4413_v53 = vld [vmem:[#allocation7 + $0xc8] ss:$16 sps:$4 sm:$0xff]   ;;  %v4418_v54 = vld [vmem:[#allocation7 + $0xe4] ss:$16 sps:$4 sm:$0xff]  }
  0xf5   :  { %1567 = vmatpush1.bf16.msra.mxu0 %v4314_v55  ;;  %1819 = vmatpush1.bf16.msra.mxu1 %v4317_v56  ;;  %v4421_v55 = vld [vmem:[#allocation7 + $0xec] ss:$16 sps:$4 sm:$0xff]   ;;  %v4416_v56 = vld [vmem:[#allocation7 + $0xe0] ss:$16 sps:$4 sm:$0xff]  }
  0xf6   :  { %1568 = vmatprep.subr.bf16.mxu0 %v4322_v57  ;;  %1820 = vmatprep.subr.bf16.mxu1 %v4325_v58  ;;  %v4419_v57 = vld [vmem:[#allocation7 + $0xe8] ss:$16 sps:$4 sm:$0xff]   ;;  %v4424_v58 = vld [vmem:[#allocation7 + $0x104] ss:$16 sps:$4 sm:$0xff]  }
  0xf9   :  { %1569 = vmatpush1.bf16.msra.mxu0 %v4320_v59  ;;  %1821 = vmatpush1.bf16.msra.mxu1 %v4323_v60  ;;  %v4427_v59 = vld [vmem:[#allocation7 + $0x10c] ss:$16 sps:$4 sm:$0xff]   ;;  %v4422_v60 = vld [vmem:[#allocation7 + $0x100] ss:$16 sps:$4 sm:$0xff]  }
  0xfa   :  { %1570 = vmatprep.subr.bf16.mxu0 %v4331_v61  ;;  %1822 = vmatprep.subr.bf16.mxu1 %v4334_v62  ;;  %v4425_v61 = vld [vmem:[#allocation7 + $0x108] ss:$16 sps:$4 sm:$0xff]   ;;  %v4430_v62 = vld [vmem:[#allocation7 + $0x124] ss:$16 sps:$4 sm:$0xff]  }
  0xfd   :  { %1571 = vmatpush1.bf16.msra.mxu0 %v4329_v63  ;;  %1823 = vmatpush1.bf16.msra.mxu1 %v4332_v0  ;;  %v4433_v63 = vld [vmem:[#allocation7 + $0x12c] ss:$16 sps:$4 sm:$0xff]   ;;  %v4428_v0 = vld [vmem:[#allocation7 + $0x120] ss:$16 sps:$4 sm:$0xff]  }
  0xfe   :  { %1572 = vmatprep.subr.bf16.mxu0 %v4337_v1  ;;  %1824 = vmatprep.subr.bf16.mxu1 %v4340_v2  ;;  %v4431_v1 = vld [vmem:[#allocation7 + $0x128] ss:$16 sps:$4 sm:$0xff]   ;;  %v4436_v2 = vld [vmem:[#allocation7 + $0x144] ss:$16 sps:$4 sm:$0xff]  }
 0x101   :  { %1573 = vmatpush1.bf16.msra.mxu0 %v4335_v3  ;;  %1825 = vmatpush1.bf16.msra.mxu1 %v4338_v4  ;;  %v4439_v3 = vld [vmem:[#allocation7 + $0x14c] ss:$16 sps:$4 sm:$0xff]   ;;  %v4434_v4 = vld [vmem:[#allocation7 + $0x140] ss:$16 sps:$4 sm:$0xff]  }
 0x102   :  { %1574 = vmatprep.subr.bf16.mxu0 %v4346_v5  ;;  %1826 = vmatprep.subr.bf16.mxu1 %v4349_v6  ;;  %v4437_v5 = vld [vmem:[#allocation7 + $0x148] ss:$16 sps:$4 sm:$0xff]   ;;  %v4442_v6 = vld [vmem:[#allocation7 + $0x164] ss:$16 sps:$4 sm:$0xff]  }
 0x105   :  { %1575 = vmatpush1.bf16.msra.mxu0 %v4344_v7  ;;  %1827 = vmatpush1.bf16.msra.mxu1 %v4347_v8  ;;  %v4445_v7 = vld [vmem:[#allocation7 + $0x16c] ss:$16 sps:$4 sm:$0xff]   ;;  %v4440_v8 = vld [vmem:[#allocation7 + $0x160] ss:$16 sps:$4 sm:$0xff]  }
 0x106   :  { %1576 = vmatprep.subr.bf16.mxu0 %v4352_v9  ;;  %1828 = vmatprep.subr.bf16.mxu1 %v4355_v10  ;;  %v4443_v9 = vld [vmem:[#allocation7 + $0x168] ss:$16 sps:$4 sm:$0xff]   ;;  %v4448_v10 = vld [vmem:[#allocation7 + $0x184] ss:$16 sps:$4 sm:$0xff]  }
 0x109   :  { %1577 = vmatpush1.bf16.msra.mxu0 %v4350_v11  ;;  %1829 = vmatpush1.bf16.msra.mxu1 %v4353_v12  ;;  %v4451_v11 = vld [vmem:[#allocation7 + $0x18c] ss:$16 sps:$4 sm:$0xff]   ;;  %v4446_v12 = vld [vmem:[#allocation7 + $0x180] ss:$16 sps:$4 sm:$0xff]  }
 0x10a   :  { %1609 = vmatprep.subr.bf16.mxu0 %v4361_v13  ;;  %1861 = vmatprep.subr.bf16.mxu1 %v4370_v14  ;;  %v4449_v13 = vld [vmem:[#allocation7 + $0x188] ss:$16 sps:$4 sm:$0xff]   ;;  %v4454_v14 = vld [vmem:[#allocation7 + $0x1a4] ss:$16 sps:$4 sm:$0xff]  }
 0x10c   :  { %1579 = vmatmul.mubr.bf16.vlgmr.msra.gmra.mrb[0].mxu0 %v4356_v15  ;;  %1831 = vmatmul.mubr.bf16.vlgmr.msra.gmra.mrb[0].mxu1 %v4356_v15  ;;  %v4457_v15 = vld [vmem:[#allocation7 + $0x1ac] ss:$16 sps:$4 sm:$0xff]  }
 0x10d   :  { %1610 = vmatpush1.bf16.msra.mxu0 %v4359_v16  ;;  %1588 = vmatprep.mubr.bf16.mxu0 %v4362_v17  ;;  %v4452_v16 = vld [vmem:[#allocation7 + $0x1a0] ss:$16 sps:$4 sm:$0xff]  }
 0x10e   :  { %1840 = vmatprep.mubr.bf16.mxu1 %v4362_v17  ;;  %1862 = vmatpush1.bf16.msra.mxu1 %v4368_v18  ;;  %v4455_v17 = vld [vmem:[#allocation7 + $0x1a8] ss:$16 sps:$4 sm:$0xff]   ;;  %v4460_v18 = vld [vmem:[#allocation7 + $0x1c4] ss:$16 sps:$4 sm:$0xff]  }
 0x10f   :  { %2750 = vmatprep.subr.bf16.mxu0 %v4376_v19  ;;  %2876 = vmatprep.subr.bf16.mxu1 %v4379_v20  ;;  %v4463_v19 = vld [vmem:[#allocation7 + $0x1cc] ss:$16 sps:$4 sm:$0xff]   ;;  %v4458_v20 = vld [vmem:[#allocation7 + $0x1c0] ss:$16 sps:$4 sm:$0xff]  }
 0x114   :  { %1589 = vmatmul.mubr.bf16.gmra.mrb[4].mxu0 %v4364_v21  ;;  %1841 = vmatmul.mubr.bf16.gmra.mrb[4].mxu1 %v4364_v21  ;;  %v4461_v21 = vld [vmem:[#allocation7 + $0x1c8] ss:$16 sps:$4 sm:$0xff]  }
 0x115   :  { %1598 = vmatprep.mubr.bf16.mxu0 %v4365_v22  ;;  %1850 = vmatprep.mubr.bf16.mxu1 %v4365_v22  ;;  %v4466_v22 = vld [vmem:[#allocation7 + $0x1e4] ss:$16 sps:$4 sm:$0xff]  }
 0x11c   :  { %1599 = vmatmul.mubr.bf16.gmra.mrb[8].mxu0 %v4367_v23  ;;  %1851 = vmatmul.mubr.bf16.gmra.mrb[8].mxu1 %v4367_v23  ;;  %v4469_v23 = vld [vmem:[#allocation7 + $0x1ec] ss:$16 sps:$4 sm:$0xff]  }
 0x11d   :  { %1641 = vmatprep.mubr.bf16.mxu0 %v4726_v24  ;;  %1893 = vmatprep.mubr.bf16.mxu1 %v4726_v24 }
 0x124   :  { %3657 = vmatmul.mubr.msk.bf16.vlgmr.msra.gmra.mrb[0].mxu0 %vm1410_vm0, %v4371_v25  ;;  %3660 = vmatmul.mubr.msk.bf16.vlgmr.msra.gmra.mrb[0].mxu1 %vm1410_vm0, %v4371_v25  ;;  %v4467_v25 = vld [vmem:[#allocation7 + $0x1e8] ss:$16 sps:$4 sm:$0xff]  }
 0x125   :  { %1651 = vmatprep.mubr.bf16.mxu0 %v4726_v24  ;;  %1903 = vmatprep.mubr.bf16.mxu1 %v4726_v24 }
 0x126   :  { %2751 = vmatpush1.bf16.msra.mxu0 %v4374_v26  ;;  %2877 = vmatpush1.bf16.msra.mxu1 %v4377_v27  ;;  %v4472_v26 = vld [vmem:[#allocation7 + $0x204] ss:$16 sps:$4 sm:$0xff]   ;;  %v4475_v27 = vld [vmem:[#allocation7 + $0x20c] ss:$16 sps:$4 sm:$0xff]  }
 0x127   :  { %2752 = vmatprep.subr.bf16.mxu0 %v4382_v28  ;;  %2878 = vmatprep.subr.bf16.mxu1 %v4385_v29  ;;  %v305_v28 = vlaneseq }
 0x129   :  { %v4837_v29 = vshrl.u32 %v305_v28, 7 }
 0x12a   :  { %2753 = vmatpush1.bf16.msra.mxu0 %v4380_v30  ;;  %2879 = vmatpush1.bf16.msra.mxu1 %v4383_v31 }
 0x12b   :  { %2754 = vmatprep.subr.bf16.mxu0 %v4388_v32  ;;  %2880 = vmatprep.subr.bf16.mxu1 %v4391_v33  ;;  %v307_v30 = vsub.s32 0, %v4837_v29  ;;  %v315_v31 = vsub.s32 2, %v4837_v29  ;;  %v303_v32 = vld [vmem:[%s4970_s2] sm:$0xf]  ;;  %v311_v33 = vsub.s32 1, %v4837_v29 }
 0x12c   :  { %3658 = vmatmul.mubr.msk.bf16.gmra.mrb[4].mxu0 %vm1410_vm0, %v4372_v34  ;;  %3661 = vmatmul.mubr.msk.bf16.gmra.mrb[4].mxu1 %vm1410_vm0, %v4372_v34  ;;  %v319_v34 = vsub.s32 3, %v4837_v29 }
 0x12d   :  { %1661 = vmatprep.mubr.bf16.mxu0 %v4726_v24  ;;  %1913 = vmatprep.mubr.bf16.mxu1 %v4726_v24  ;;  %v4464_v24 = vld [vmem:[#allocation7 + $0x1e0] ss:$16 sps:$4 sm:$0xff]  }
 0x12e   :  { %2755 = vmatpush1.bf16.msra.mxu0 %v4386_v35  ;;  %2881 = vmatpush1.bf16.msra.mxu1 %v4389_v36  ;;  %v4848_v35 = vrot.slane %v303_v32, %v307_v30  ;;  %v4852_v36 = vrot.slane %v303_v32, %v315_v31 }
 0x12f   :  { %2756 = vmatprep.subr.bf16.mxu0 %v4394_v37  ;;  %2882 = vmatprep.subr.bf16.mxu1 %v4397_v38  ;;  %v4856_v37 = vrot.slane %v303_v32, %v311_v33  ;;  %v4860_v38 = vrot.slane %v303_v32, %v319_v34 }
 0x132   :  { %2757 = vmatpush1.bf16.msra.mxu0 %v4392_v39  ;;  %2883 = vmatpush1.bf16.msra.mxu1 %v4395_v40 }
 0x133   :  { %2758 = vmatprep.subr.bf16.mxu0 %v4400_v41  ;;  %2884 = vmatprep.subr.bf16.mxu1 %v4403_v42 }
 0x134   :  { %3659 = vmatmul.mubr.msk.bf16.gmra.mrb[8].mxu0 %vm1410_vm0, %v4373_v43  ;;  %3662 = vmatmul.mubr.msk.bf16.gmra.mrb[8].mxu1 %vm1410_vm0, %v4373_v43 }
 0x136   :  { %2759 = vmatpush1.bf16.msra.mxu0 %v4398_v44  ;;  %2885 = vmatpush1.bf16.msra.mxu1 %v4401_v45 }
 0x137   :  { %2760 = vmatprep.subr.bf16.mxu0 %v4406_v46  ;;  %2886 = vmatprep.subr.bf16.mxu1 %v4409_v47 }
 0x13a   :  { %2761 = vmatpush1.bf16.msra.mxu0 %v4404_v48  ;;  %2887 = vmatpush1.bf16.msra.mxu1 %v4407_v49 }
 0x13b   :  { %2762 = vmatprep.subr.bf16.mxu0 %v4412_v50  ;;  %2888 = vmatprep.subr.bf16.mxu1 %v4415_v51 }
 0x13e   :  { %2763 = vmatpush1.bf16.msra.mxu0 %v4410_v52  ;;  %2889 = vmatpush1.bf16.msra.mxu1 %v4413_v53 }
 0x13f   :  { %2764 = vmatprep.subr.bf16.mxu0 %v4418_v54  ;;  %2890 = vmatprep.subr.bf16.mxu1 %v4421_v55 }
 0x142   :  { %2765 = vmatpush1.bf16.msra.mxu0 %v4416_v56  ;;  %2891 = vmatpush1.bf16.msra.mxu1 %v4419_v57 }
 0x143   :  { %2766 = vmatprep.subr.bf16.mxu0 %v4424_v58  ;;  %2892 = vmatprep.subr.bf16.mxu1 %v4427_v59 }
 0x146   :  { %2767 = vmatpush1.bf16.msra.mxu0 %v4422_v60  ;;  %2893 = vmatpush1.bf16.msra.mxu1 %v4425_v61 }
 0x147   :  { %2768 = vmatprep.subr.bf16.mxu0 %v4430_v62  ;;  %2894 = vmatprep.subr.bf16.mxu1 %v4433_v63 }
 0x14a   :  { %2769 = vmatpush1.bf16.msra.mxu0 %v4428_v0  ;;  %2895 = vmatpush1.bf16.msra.mxu1 %v4431_v1 }
 0x14b   :  { %2770 = vmatprep.subr.bf16.mxu0 %v4436_v2  ;;  %2896 = vmatprep.subr.bf16.mxu1 %v4439_v3 }
 0x14e   :  { %2771 = vmatpush1.bf16.msra.mxu0 %v4434_v4  ;;  %2897 = vmatpush1.bf16.msra.mxu1 %v4437_v5  ;;  %v4470_v5 = vld [vmem:[#allocation7 + $0x200] ss:$16 sps:$4 sm:$0xff]  }
 0x14f   :  { %2772 = vmatprep.subr.bf16.mxu0 %v4442_v6  ;;  %2898 = vmatprep.subr.bf16.mxu1 %v4445_v7  ;;  %v4473_v6 = vld [vmem:[#allocation7 + $0x208] ss:$16 sps:$4 sm:$0xff]  }
 0x152   :  { %2773 = vmatpush1.bf16.msra.mxu0 %v4440_v8  ;;  %2899 = vmatpush1.bf16.msra.mxu1 %v4443_v9 }
 0x153   :  { %2774 = vmatprep.subr.bf16.mxu0 %v4448_v10  ;;  %2900 = vmatprep.subr.bf16.mxu1 %v4451_v11  ;;  %v4478_v11 = vld [vmem:[#allocation7 + $0x224] ss:$16 sps:$4 sm:$0xff]  }
 0x156   :  { %2775 = vmatpush1.bf16.msra.mxu0 %v4446_v12  ;;  %2901 = vmatpush1.bf16.msra.mxu1 %v4449_v13  ;;  %v4481_v12 = vld [vmem:[#allocation7 + $0x22c] ss:$16 sps:$4 sm:$0xff]  }
 0x157   :  { %2776 = vmatprep.subr.bf16.mxu0 %v4454_v14  ;;  %2902 = vmatprep.subr.bf16.mxu1 %v4457_v15 }
 0x15a   :  { %2777 = vmatpush1.bf16.msra.mxu0 %v4452_v16  ;;  %2903 = vmatpush1.bf16.msra.mxu1 %v4455_v17 }
 0x15b   :  { %2778 = vmatprep.subr.bf16.mxu0 %v4460_v18  ;;  %2904 = vmatprep.subr.bf16.mxu1 %v4463_v19 }
 0x15e   :  { %2779 = vmatpush1.bf16.msra.mxu0 %v4458_v20  ;;  %2905 = vmatpush1.bf16.msra.mxu1 %v4461_v21 }
 0x15f   :  { %2780 = vmatprep.subr.bf16.mxu0 %v4466_v22  ;;  %2906 = vmatprep.subr.bf16.mxu1 %v4469_v23  ;;  %v4476_v23 = vld [vmem:[#allocation7 + $0x220] ss:$16 sps:$4 sm:$0xff]  }
 0x162   :  { %2781 = vmatpush1.bf16.msra.mxu0 %v4464_v24  ;;  %2907 = vmatpush1.bf16.msra.mxu1 %v4467_v25  ;;  %v4479_v24 = vld [vmem:[#allocation7 + $0x228] ss:$16 sps:$4 sm:$0xff]   ;;  %v4484_v25 = vld [vmem:[#allocation7 + $0x244] ss:$16 sps:$4 sm:$0xff]  }
 0x163   :  { %2813 = vmatprep.subr.bf16.mxu0 %v4472_v26  ;;  %2939 = vmatprep.subr.bf16.mxu1 %v4475_v27 }
 0x1f7   :  { %v1643_v39 = vpop.f32.mrb[0].mxu0  ;;  %v1895_v40 = vpop.f32.mrb[0].mxu1 }
 0x1f8   :  { %v3892_v41 = vadd.f32 %v1643_v39, %v4848_v35  ;;  %v3904_v42 = vadd.f32 %v1895_v40, %v4852_v36  ;;  %v1645_v43 = vpop.f32.mrb[1].mxu0  ;;  %v1897_v44 = vpop.f32.mrb[1].mxu1  ;;  %v4487_v39 = vld [vmem:[#allocation7 + $0x24c] ss:$16 sps:$4 sm:$0xff]  }
 0x1f9   :  { %v3893_v45 = vadd.f32 %v1645_v43, %v4856_v37  ;;  %v3905_v46 = vadd.f32 %v1897_v44, %v4860_v38  ;;  %v1647_v47 = vpop.f32.mrb[2].mxu0  ;;  %v1899_v48 = vpop.f32.mrb[2].mxu1 }
 0x1fa   :  { %v3894_v49 = vadd.f32 %v1647_v47, %v4848_v35  ;;  %v3906_v50 = vadd.f32 %v1899_v48, %v4852_v36  ;;  %v1649_v51 = vpop.f32.mrb[3].mxu0  ;;  %v1901_v52 = vpop.f32.mrb[3].mxu1  ;;  %v1924_v55 = vmax.f32 %v3892_v41, 0.0  ;;  %v1926_v56 = vmax.f32 %v3904_v42, 0.0 }
 0x1fb   :  { %v3895_v53 = vadd.f32 %v1649_v51, %v4856_v37  ;;  %v3907_v54 = vadd.f32 %v1901_v52, %v4860_v38  ;;  %v1925_v59 = vmax.f32 %v3893_v45, 0.0  ;;  %v1927_v60 = vmax.f32 %v3905_v46, 0.0  ;;  %v4485_v51 = vld [vmem:[#allocation7 + $0x248] ss:$16 sps:$4 sm:$0xff]  }
 0x1fc   :  { %v1928_v57 = vmax.f32 %v3894_v49, 0.0  ;;  %v1930_v58 = vmax.f32 %v3906_v50, 0.0  ;;  %v4482_v50 = vld [vmem:[#allocation7 + $0x240] ss:$16 sps:$4 sm:$0xff]  }
 0x1fd   :  { %v1929_v61 = vmax.f32 %v3895_v53, 0.0  ;;  %v1931_v62 = vmax.f32 %v3907_v54, 0.0 }
 0x1fe   :  { %v1948_v63 = vpack.c.bf16 %v1928_v57, %v1924_v55  ;;  %v4870_v0 = vpack.c.bf16 %v1930_v58, %v1926_v56  ;;  %v4490_v56 = vld [vmem:[#allocation7 + $0x264] ss:$16 sps:$4 sm:$0xff]   ;;  %v4493_v57 = vld [vmem:[#allocation7 + $0x26c] ss:$16 sps:$4 sm:$0xff]  }
 0x1ff   :  { %v1949_v1 = vpack.c.bf16 %v1929_v61, %v1925_v59  ;;  %v4872_v2 = vpack.c.bf16 %v1931_v62, %v1927_v60  ;;  %v1653_v3 = vpop.f32.mrb[4].mxu0  ;;  %v1905_v4 = vpop.f32.mrb[4].mxu1 }
 0x200   :  { %v3896_v7 = vadd.f32 %v1653_v3, %v4848_v35  ;;  %v3908_v8 = vadd.f32 %v1905_v4, %v4852_v36  ;;  %v1655_v9 = vpop.f32.mrb[5].mxu0  ;;  %v1907_v10 = vpop.f32.mrb[5].mxu1 }
 0x201   :  { %v3897_v13 = vadd.f32 %v1655_v9, %v4856_v37  ;;  %v3909_v14 = vadd.f32 %v1907_v10, %v4860_v38  ;;  %v1657_v15 = vpop.f32.mrb[6].mxu0  ;;  %v1909_v16 = vpop.f32.mrb[6].mxu1  ;;  %2782 = vmatprep.mubr.bf16.mxu0 %v1949_v1  ;;  %2908 = vmatprep.mubr.bf16.mxu1 %v1949_v1 }
 0x202   :  { %v3898_v17 = vadd.f32 %v1657_v15, %v4848_v35  ;;  %v3910_v18 = vadd.f32 %v1909_v16, %v4852_v36  ;;  %v1659_v19 = vpop.f32.mrb[7].mxu0  ;;  %v1911_v20 = vpop.f32.mrb[7].mxu1  ;;  %2783 = vmatmul.mubr.bf16.vlgmr.msra.gmra.mrb[12].mxu0 %v1948_v63  ;;  %2909 = vmatmul.mubr.bf16.vlgmr.msra.gmra.mrb[12].mxu1 %v1948_v63  ;;  %v1932_v26 = vmax.f32 %v3896_v7, 0.0  ;;  %v1934_v27 = vmax.f32 %v3908_v8, 0.0  ;;  %v4491_v7 = vld [vmem:[#allocation7 + $0x268] ss:$16 sps:$4 sm:$0xff]  }
 0x203   :  { %v3899_v21 = vadd.f32 %v1659_v19, %v4856_v37  ;;  %v3911_v22 = vadd.f32 %v1911_v20, %v4860_v38  ;;  %2814 = vmatpush1.bf16.msra.mxu0 %v4470_v5  ;;  %2940 = vmatpush1.bf16.msra.mxu1 %v4473_v6  ;;  %v1933_v40 = vmax.f32 %v3897_v13, 0.0  ;;  %v1935_v41 = vmax.f32 %v3909_v14, 0.0  ;;  %v4488_v6 = vld [vmem:[#allocation7 + $0x260] ss:$16 sps:$4 sm:$0xff]   ;;  %v4496_v8 = vld [vmem:[#allocation7 + $0x284] ss:$16 sps:$4 sm:$0xff]  }
 0x204   :  { %v1936_v28 = vmax.f32 %v3898_v17, 0.0  ;;  %v1938_v32 = vmax.f32 %v3910_v18, 0.0  ;;  %2815 = vmatprep.subr.bf16.mxu0 %v4478_v11  ;;  %2941 = vmatprep.subr.bf16.mxu1 %v4481_v12  ;;  %v4494_v18 = vld [vmem:[#allocation7 + $0x280] ss:$16 sps:$4 sm:$0xff]   ;;  %v4497_v19 = vld [vmem:[#allocation7 + $0x288] ss:$16 sps:$4 sm:$0xff]  }
 0x205   :  { %v1937_v42 = vmax.f32 %v3899_v21, 0.0  ;;  %v1939_v43 = vmax.f32 %v3911_v22, 0.0  ;;  %v4502_v20 = vld [vmem:[#allocation7 + $0x2a4] ss:$16 sps:$4 sm:$0xff]   ;;  %v4505_v21 = vld [vmem:[#allocation7 + $0x2ac] ss:$16 sps:$4 sm:$0xff]  }
 0x206   :  { %v1952_v44 = vpack.c.bf16 %v1936_v28, %v1932_v26  ;;  %v4882_v45 = vpack.c.bf16 %v1938_v32, %v1934_v27  ;;  %v4500_v22 = vld [vmem:[#allocation7 + $0x2a0] ss:$16 sps:$4 sm:$0xff]   ;;  %v4509_v27 = vld [vmem:[#allocation7 + $0x2c8] ss:$16 sps:$4 sm:$0xff]   ;;  %v4514_v28 = vld [vmem:[#allocation7 + $0x2e4] ss:$16 sps:$4 sm:$0xff]  }
 0x207   :  { %v1953_v46 = vpack.c.bf16 %v1937_v42, %v1933_v40  ;;  %v4884_v47 = vpack.c.bf16 %v1939_v43, %v1935_v41  ;;  %2816 = vmatpush1.bf16.msra.mxu0 %v4476_v23  ;;  %2942 = vmatpush1.bf16.msra.mxu1 %v4479_v24  ;;  %v1663_v48 = vpop.f32.mrb[8].mxu0  ;;  %v1915_v49 = vpop.f32.mrb[8].mxu1  ;;  %v4503_v23 = vld [vmem:[#allocation7 + $0x2a8] ss:$16 sps:$4 sm:$0xff]   ;;  %v4508_v24 = vld [vmem:[#allocation7 + $0x2c4] ss:$16 sps:$4 sm:$0xff]  }
 0x208   :  { %v3900_v52 = vadd.f32 %v1663_v48, %v4848_v35  ;;  %v3912_v53 = vadd.f32 %v1915_v49, %v4852_v36  ;;  %v1665_v54 = vpop.f32.mrb[9].mxu0  ;;  %v1917_v55 = vpop.f32.mrb[9].mxu1  ;;  %2817 = vmatprep.subr.bf16.mxu0 %v4484_v25  ;;  %2943 = vmatprep.subr.bf16.mxu1 %v4487_v39  ;;  %v4511_v25 = vld [vmem:[#allocation7 + $0x2cc] ss:$16 sps:$4 sm:$0xff]   ;;  %v4506_v26 = vld [vmem:[#allocation7 + $0x2c0] ss:$16 sps:$4 sm:$0xff]  }
 0x209   :  { %v3901_v58 = vadd.f32 %v1665_v54, %v4856_v37  ;;  %v3913_v59 = vadd.f32 %v1917_v55, %v4860_v38  ;;  %v1667_v60 = vpop.f32.mrb[10].mxu0  ;;  %v1919_v61 = vpop.f32.mrb[10].mxu1  ;;  %2792 = vmatprep.mubr.bf16.mxu0 %v1953_v46  ;;  %2918 = vmatprep.mubr.bf16.mxu1 %v1953_v46  ;;  %v4517_v32 = vld [vmem:[#allocation7 + $0x2ec] ss:$16 sps:$4 sm:$0xff]   ;;  %v4512_v39 = vld [vmem:[#allocation7 + $0x2e0] ss:$16 sps:$4 sm:$0xff]  }
 0x20a   :  { %v3902_v62 = vadd.f32 %v1667_v60, %v4848_v35  ;;  %v3914_v63 = vadd.f32 %v1919_v61, %v4852_v36  ;;  %v1669_v1 = vpop.f32.mrb[11].mxu0  ;;  %v1921_v3 = vpop.f32.mrb[11].mxu1  ;;  %2793 = vmatmul.mubr.bf16.gmra.mrb[16].mxu0 %v1952_v44  ;;  %2919 = vmatmul.mubr.bf16.gmra.mrb[16].mxu1 %v1952_v44  ;;  %v1940_v9 = vmax.f32 %v3900_v52, 0.0  ;;  %v1942_v10 = vmax.f32 %v3912_v53, 0.0  ;;  %v4499_v35 = vld [vmem:[#allocation7 + $0x28c] ss:$16 sps:$4 sm:$0xff]  }
 0x20b   :  { %v3903_v4 = vadd.f32 %v1669_v1, %v4856_v37  ;;  %v3915_v5 = vadd.f32 %v1921_v3, %v4860_v38  ;;  %2818 = vmatpush1.bf16.msra.mxu0 %v4482_v50  ;;  %2944 = vmatpush1.bf16.msra.mxu1 %v4485_v51  ;;  %v1941_v36 = vmax.f32 %v3901_v58, 0.0  ;;  %v1943_v13 = vmax.f32 %v3913_v59, 0.0  ;;  %v4515_v40 = vld [vmem:[#allocation7 + $0x2e8] ss:$16 sps:$4 sm:$0xff]   ;;  %v4520_v41 = vld [vmem:[#allocation7 + $0x304] ss:$16 sps:$4 sm:$0xff]  }
 0x20c   :  { %v1944_v11 = vmax.f32 %v3902_v62, 0.0  ;;  %v1946_v12 = vmax.f32 %v3914_v63, 0.0  ;;  %2819 = vmatprep.subr.bf16.mxu0 %v4490_v56  ;;  %2945 = vmatprep.subr.bf16.mxu1 %v4493_v57  ;;  %v4518_v42 = vld [vmem:[#allocation7 + $0x300] ss:$16 sps:$4 sm:$0xff]   ;;  %v4521_v43 = vld [vmem:[#allocation7 + $0x308] ss:$16 sps:$4 sm:$0xff]  }
 0x20d   :  { %v1945_v14 = vmax.f32 %v3903_v4, 0.0  ;;  %v1947_v15 = vmax.f32 %v3915_v5, 0.0  ;;  %v4526_v44 = vld [vmem:[#allocation7 + $0x324] ss:$16 sps:$4 sm:$0xff]   ;;  %v4529_v46 = vld [vmem:[#allocation7 + $0x32c] ss:$16 sps:$4 sm:$0xff]  }
 0x20e   :  { %v1956_v16 = vpack.c.bf16 %v1944_v11, %v1940_v9  ;;  %v4894_v37 = vpack.c.bf16 %v1946_v12, %v1942_v10  ;;  %v4524_v48 = vld [vmem:[#allocation7 + $0x320] ss:$16 sps:$4 sm:$0xff]   ;;  %v4527_v49 = vld [vmem:[#allocation7 + $0x328] ss:$16 sps:$4 sm:$0xff]   ;;  %v4532_v50 = vld [vmem:[#allocation7 + $0x344] ss:$16 sps:$4 sm:$0xff]  }
 0x20f   :  { %v1957_v38 = vpack.c.bf16 %v1945_v14, %v1941_v36  ;;  %v4896_v17 = vpack.c.bf16 %v1947_v15, %v1943_v13  ;;  %2820 = vmatpush1.bf16.msra.mxu0 %v4488_v6  ;;  %2946 = vmatpush1.bf16.msra.mxu1 %v4491_v7  ;;  %v4535_v51 = vld [vmem:[#allocation7 + $0x34c] ss:$16 sps:$4 sm:$0xff]   ;;  %v4530_v52 = vld [vmem:[#allocation7 + $0x340] ss:$16 sps:$4 sm:$0xff]   ;;  %v4533_v53 = vld [vmem:[#allocation7 + $0x348] ss:$16 sps:$4 sm:$0xff]  }
 0x210   :  { %2821 = vmatprep.subr.bf16.mxu0 %v4496_v8  ;;  %2947 = vmatprep.subr.bf16.mxu1 %v4499_v35  ;;  %v4538_v54 = vld [vmem:[#allocation7 + $0x364] ss:$16 sps:$4 sm:$0xff]   ;;  %v4541_v55 = vld [vmem:[#allocation7 + $0x36c] ss:$16 sps:$4 sm:$0xff]   ;;  %v4536_v56 = vld [vmem:[#allocation7 + $0x360] ss:$16 sps:$4 sm:$0xff]  }
 0x211   :  { %2802 = vmatprep.mubr.bf16.mxu0 %v1957_v38  ;;  %2928 = vmatprep.mubr.bf16.mxu1 %v1957_v38  ;;  %v4539_v57 = vld [vmem:[#allocation7 + $0x368] ss:$16 sps:$4 sm:$0xff]   ;;  %v4544_v58 = vld [vmem:[#allocation7 + $0x384] ss:$16 sps:$4 sm:$0xff]   ;;  %v4547_v59 = vld [vmem:[#allocation7 + $0x38c] ss:$16 sps:$4 sm:$0xff]  }
 0x212   :  { %2803 = vmatmul.mubr.bf16.gmra.mrb[20].mxu0 %v1956_v16  ;;  %2929 = vmatmul.mubr.bf16.gmra.mrb[20].mxu1 %v1956_v16  ;;  %v4542_v60 = vld [vmem:[#allocation7 + $0x380] ss:$16 sps:$4 sm:$0xff]   ;;  %v4545_v61 = vld [vmem:[#allocation7 + $0x388] ss:$16 sps:$4 sm:$0xff]   ;;  %v4550_v62 = vld [vmem:[#allocation7 + $0x3a4] ss:$16 sps:$4 sm:$0xff]  }
 0x213   :  { %2822 = vmatpush1.bf16.msra.mxu0 %v4494_v18  ;;  %2948 = vmatpush1.bf16.msra.mxu1 %v4497_v19  ;;  %v4553_v63 = vld [vmem:[#allocation7 + $0x3ac] ss:$16 sps:$4 sm:$0xff]   ;;  %v4548_v1 = vld [vmem:[#allocation7 + $0x3a0] ss:$16 sps:$4 sm:$0xff]   ;;  %v4551_v3 = vld [vmem:[#allocation7 + $0x3a8] ss:$16 sps:$4 sm:$0xff]  }
 0x214   :  { %2845 = vmatprep.mubr.bf16.mxu0 %v4872_v2  ;;  %2971 = vmatprep.mubr.bf16.mxu1 %v4872_v2  ;;  %v4523_v2 = vld [vmem:[#allocation7 + $0x30c] ss:$16 sps:$4 sm:$0xff]   ;;  %v4556_v4 = vld [vmem:[#allocation7 + $0x3c4] ss:$16 sps:$4 sm:$0xff]   ;;  %v4554_v6 = vld [vmem:[#allocation7 + $0x3c0] ss:$16 sps:$4 sm:$0xff]  }
 0x215   :  { %2823 = vmatprep.subr.bf16.mxu0 %v4502_v20  ;;  %2949 = vmatprep.subr.bf16.mxu1 %v4505_v21  ;;  %v4559_v5 = vld [vmem:[#allocation7 + $0x3cc] ss:$16 sps:$4 sm:$0xff]   ;;  %v4557_v7 = vld [vmem:[#allocation7 + $0x3c8] ss:$16 sps:$4 sm:$0xff]   ;;  %v4562_v8 = vld [vmem:[#allocation7 + $0x3e4] ss:$16 sps:$4 sm:$0xff]  }
 0x216   :  { %v4565_v9 = vld [vmem:[#allocation7 + $0x3ec] ss:$16 sps:$4 sm:$0xff]   ;;  %v4560_v10 = vld [vmem:[#allocation7 + $0x3e0] ss:$16 sps:$4 sm:$0xff]   ;;  %v4563_v11 = vld [vmem:[#allocation7 + $0x3e8] ss:$16 sps:$4 sm:$0xff]  }
 0x217   :  { %2824 = vmatpush1.bf16.msra.mxu0 %v4500_v22  ;;  %2950 = vmatpush1.bf16.msra.mxu1 %v4503_v23  ;;  %v4566_v12 = vld [vmem:[#allocation8 + $0x40] sm:$0xff]   ;;  %v4570_v14 = vld [vmem:[#allocation8 + $0x48] sm:$0xff]   ;;  %v4574_v18 = vld [vmem:[#allocation8 + $0x50] sm:$0xff]  }
 0x218   :  { %2825 = vmatprep.subr.bf16.mxu0 %v4508_v24  ;;  %2951 = vmatprep.subr.bf16.mxu1 %v4511_v25  ;;  %v4567_v35 = vld [vmem:[#allocation8 + $0xc0] sm:$0xff]   ;;  %v4571_v15 = vld [vmem:[#allocation8 + $0xc8] sm:$0xff]   ;;  %v4575_v19 = vld [vmem:[#allocation8 + $0xd0] sm:$0xff]  }
 0x219   :  { %v4568_v36 = vld [vmem:[#allocation8] sm:$0xff]   ;;  %v4572_v16 = vld [vmem:[#allocation8 + $0x8] sm:$0xff]   ;;  %v4576_v20 = vld [vmem:[#allocation8 + $0x10] sm:$0xff]  }
 0x21a   :  { %v4569_v13 = vld [vmem:[#allocation8 + $0x80] sm:$0xff]   ;;  %v4573_v38 = vld [vmem:[#allocation8 + $0x88] sm:$0xff]   ;;  %v4577_v21 = vld [vmem:[#allocation8 + $0x90] sm:$0xff]  }
 0x21b   :  { %2826 = vmatpush1.bf16.msra.mxu0 %v4506_v26  ;;  %2952 = vmatpush1.bf16.msra.mxu1 %v4509_v27  ;;  %v4578_v22 = vld [vmem:[#allocation8 + $0x58] sm:$0xff]   ;;  %v4582_v24 = vld [vmem:[#allocation8 + $0x60] sm:$0xff]  }
 0x21c   :  { %2827 = vmatprep.subr.bf16.mxu0 %v4514_v28  ;;  %2953 = vmatprep.subr.bf16.mxu1 %v4517_v32  ;;  %v4581_v23 = vld [vmem:[#allocation8 + $0x98] sm:$0xff]   ;;  %v4583_v25 = vld [vmem:[#allocation8 + $0xe0] sm:$0xff]   ;;  %v4586_v28 = vld [vmem:[#allocation8 + $0x68] sm:$0xff]  }
 0x21d   :  { %v4584_v26 = vld [vmem:[#allocation8 + $0x20] sm:$0xff]   ;;  %v4589_v32 = vld [vmem:[#allocation8 + $0xa8] sm:$0xff]  }
 0x21e   :  { %v4585_v27 = vld [vmem:[#allocation8 + $0xa0] sm:$0xff]  }
 0x21f   :  { %2828 = vmatpush1.bf16.msra.mxu0 %v4512_v39  ;;  %2954 = vmatpush1.bf16.msra.mxu1 %v4515_v40  ;;  %v4590_v39 = vld [vmem:[#allocation8 + $0x70] sm:$0xff]  }
 0x220   :  { %2829 = vmatprep.subr.bf16.mxu0 %v4520_v41  ;;  %2955 = vmatprep.subr.bf16.mxu1 %v4523_v2  ;;  %v4591_v40 = vld [vmem:[#allocation8 + $0xf0] sm:$0xff]  }
 0x221   :  { %v4592_v41 = vld [vmem:[#allocation8 + $0x30] sm:$0xff]  }
 0x222   :  { %v4593_v2 = vld [vmem:[#allocation8 + $0xb0] sm:$0xff]  }
 0x223   :  { %2830 = vmatpush1.bf16.msra.mxu0 %v4518_v42  ;;  %2956 = vmatpush1.bf16.msra.mxu1 %v4521_v43  ;;  %v4594_v42 = vld [vmem:[#allocation8 + $0x78] sm:$0xff]  }
 0x224   :  { %2831 = vmatprep.subr.bf16.mxu0 %v4526_v44  ;;  %2957 = vmatprep.subr.bf16.mxu1 %v4529_v46  ;;  %v4595_v43 = vld [vmem:[#allocation8 + $0xf8] sm:$0xff]  }
 0x225   :  { %v4596_v44 = vld [vmem:[#allocation8 + $0x38] sm:$0xff]  }
 0x226   :  { %v2088_v46 = vld [vmem:[%s4972_s4] sm:$0xf] }
 0x227   :  { %2832 = vmatpush1.bf16.msra.mxu0 %v4524_v48  ;;  %2958 = vmatpush1.bf16.msra.mxu1 %v4527_v49  ;;  %v4915_v48 = vrot.slane %v2088_v46, %v307_v30  ;;  %v4919_v49 = vrot.slane %v2088_v46, %v315_v31 }
 0x228   :  { %2833 = vmatprep.subr.bf16.mxu0 %v4532_v50  ;;  %2959 = vmatprep.subr.bf16.mxu1 %v4535_v51  ;;  %v4923_v50 = vrot.slane %v2088_v46, %v311_v33  ;;  %v4927_v51 = vrot.slane %v2088_v46, %v319_v34 }
 0x22b   :  { %2834 = vmatpush1.bf16.msra.mxu0 %v4530_v52  ;;  %2960 = vmatpush1.bf16.msra.mxu1 %v4533_v53 }
 0x22c   :  { %2835 = vmatprep.subr.bf16.mxu0 %v4538_v54  ;;  %2961 = vmatprep.subr.bf16.mxu1 %v4541_v55 }
 0x22f   :  { %2836 = vmatpush1.bf16.msra.mxu0 %v4536_v56  ;;  %2962 = vmatpush1.bf16.msra.mxu1 %v4539_v57 }
 0x230   :  { %2837 = vmatprep.subr.bf16.mxu0 %v4544_v58  ;;  %2963 = vmatprep.subr.bf16.mxu1 %v4547_v59 }
 0x233   :  { %2838 = vmatpush1.bf16.msra.mxu0 %v4542_v60  ;;  %2964 = vmatpush1.bf16.msra.mxu1 %v4545_v61 }
 0x234   :  { %2839 = vmatprep.subr.bf16.mxu0 %v4550_v62  ;;  %2965 = vmatprep.subr.bf16.mxu1 %v4553_v63 }
 0x237   :  { %2840 = vmatpush1.bf16.msra.mxu0 %v4548_v1  ;;  %2966 = vmatpush1.bf16.msra.mxu1 %v4551_v3 }
 0x238   :  { %2841 = vmatprep.subr.bf16.mxu0 %v4556_v4  ;;  %2967 = vmatprep.subr.bf16.mxu1 %v4559_v5 }
 0x23b   :  { %2842 = vmatpush1.bf16.msra.mxu0 %v4554_v6  ;;  %2968 = vmatpush1.bf16.msra.mxu1 %v4557_v7 }
 0x23c   :  { %2843 = vmatprep.subr.bf16.mxu0 %v4562_v8  ;;  %2969 = vmatprep.subr.bf16.mxu1 %v4565_v9 }
 0x23f   :  { %2844 = vmatpush1.bf16.msra.mxu0 %v4560_v10  ;;  %2970 = vmatpush1.bf16.msra.mxu1 %v4563_v11 }
 0x240   :  { %3824 = vmatprep.subr.bf16.mxu0 %v4566_v12  ;;  %3858 = vmatprep.subr.bf16.mxu1 %v4567_v35 }
 0x242   :  { %2846 = vmatmul.mubr.bf16.vlgmr.msra.gmra.mrb[12].mxu0 %v4870_v0  ;;  %2972 = vmatmul.mubr.bf16.vlgmr.msra.gmra.mrb[12].mxu1 %v4870_v0  ;;  %v4579_v0 = vld [vmem:[#allocation8 + $0xd8] sm:$0xff]  }
 0x243   :  { %2855 = vmatprep.mubr.bf16.mxu0 %v4884_v47  ;;  %2981 = vmatprep.mubr.bf16.mxu1 %v4884_v47  ;;  %v4580_v47 = vld [vmem:[#allocation8 + $0x18] sm:$0xff]  }
 0x244   :  { %3825 = vmatpush3.bf16.msra.mxu0 %v4568_v36  ;;  %3859 = vmatpush3.bf16.msra.mxu1 %v4569_v13 }
 0x245   :  { %3826 = vmatprep.subr.bf16.mxu0 %v4570_v14  ;;  %3860 = vmatprep.subr.bf16.mxu1 %v4571_v15 }
 0x248   :  { %3827 = vmatpush3.bf16.msra.mxu0 %v4572_v16  ;;  %3861 = vmatpush3.bf16.msra.mxu1 %v4573_v38 }
 0x249   :  { %3828 = vmatprep.subr.bf16.mxu0 %v4574_v18  ;;  %3862 = vmatprep.subr.bf16.mxu1 %v4575_v19 }
 0x24a   :  { %2856 = vmatmul.mubr.bf16.gmra.mrb[16].mxu0 %v4882_v45  ;;  %2982 = vmatmul.mubr.bf16.gmra.mrb[16].mxu1 %v4882_v45  ;;  %v4587_v45 = vld [vmem:[#allocation8 + $0xe8] sm:$0xff]  }
 0x24b   :  { %2865 = vmatprep.mubr.bf16.mxu0 %v4896_v17  ;;  %2991 = vmatprep.mubr.bf16.mxu1 %v4896_v17  ;;  %v4588_v17 = vld [vmem:[#allocation8 + $0x28] sm:$0xff]  }
 0x24c   :  { %3829 = vmatpush3.bf16.msra.mxu0 %v4576_v20  ;;  %3863 = vmatpush3.bf16.msra.mxu1 %v4577_v21 }
 0x24d   :  { %3830 = vmatprep.subr.bf16.mxu0 %v4578_v22  ;;  %3864 = vmatprep.subr.bf16.mxu1 %v4579_v0 }
 0x250   :  { %3831 = vmatpush3.bf16.msra.mxu0 %v4580_v47  ;;  %3865 = vmatpush3.bf16.msra.mxu1 %v4581_v23 }
 0x251   :  { %3832 = vmatprep.subr.bf16.mxu0 %v4582_v24  ;;  %3866 = vmatprep.subr.bf16.mxu1 %v4583_v25 }
 0x252   :  { %2866 = vmatmul.mubr.bf16.gmra.mrb[20].mxu0 %v4894_v37  ;;  %2992 = vmatmul.mubr.bf16.gmra.mrb[20].mxu1 %v4894_v37  ;;  %v4597_v37 = vld [vmem:[#allocation8 + $0xb8] sm:$0xff]  }
 0x254   :  { %3833 = vmatpush3.bf16.msra.mxu0 %v4584_v26  ;;  %3867 = vmatpush3.bf16.msra.mxu1 %v4585_v27 }
 0x255   :  { %3834 = vmatprep.subr.bf16.mxu0 %v4586_v28  ;;  %3868 = vmatprep.subr.bf16.mxu1 %v4587_v45 }
 0x258   :  { %3835 = vmatpush3.bf16.msra.mxu0 %v4588_v17  ;;  %3869 = vmatpush3.bf16.msra.mxu1 %v4589_v32 }
 0x259   :  { %3836 = vmatprep.subr.bf16.mxu0 %v4590_v39  ;;  %3870 = vmatprep.subr.bf16.mxu1 %v4591_v40 }
 0x25c   :  { %3837 = vmatpush3.bf16.msra.mxu0 %v4592_v41  ;;  %3871 = vmatpush3.bf16.msra.mxu1 %v4593_v2 }
 0x25d   :  { %3838 = vmatprep.subr.bf16.mxu0 %v4594_v42  ;;  %3872 = vmatprep.subr.bf16.mxu1 %v4595_v43 }
 0x260   :  { %3839 = vmatpush3.bf16.msra.mxu0 %v4596_v44  ;;  %3873 = vmatpush3.bf16.msra.mxu1 %v4597_v37 }
 0x315   :  { %v2847_v52 = vpop.f32.mrb[12].mxu0  ;;  %v2973_v53 = vpop.f32.mrb[12].mxu1 }
 0x316   :  { %v3916_v54 = vadd.f32 %v2847_v52, %v4915_v48  ;;  %v3928_v55 = vadd.f32 %v2973_v53, %v4919_v49  ;;  %v2849_v30 = vpop.f32.mrb[13].mxu0  ;;  %v2975_v56 = vpop.f32.mrb[13].mxu1 }
 0x317   :  { %v3917_v57 = vadd.f32 %v2849_v30, %v4923_v50  ;;  %v3929_v31 = vadd.f32 %v2975_v56, %v4927_v51  ;;  %v2851_v58 = vpop.f32.mrb[14].mxu0  ;;  %v2977_v59 = vpop.f32.mrb[14].mxu1 }
 0x318   :  { %v3918_v33 = vadd.f32 %v2851_v58, %v4915_v48  ;;  %v3930_v29 = vadd.f32 %v2977_v59, %v4919_v49  ;;  %v2853_v34 = vpop.f32.mrb[15].mxu0  ;;  %v2979_v60 = vpop.f32.mrb[15].mxu1  ;;  %v3002_v63 = vmax.f32 %v3916_v54, 0.0  ;;  %v3004_v1 = vmax.f32 %v3928_v55, 0.0 }
 0x319   :  { %v3919_v61 = vadd.f32 %v2853_v34, %v4923_v50  ;;  %v3931_v62 = vadd.f32 %v2979_v60, %v4927_v51  ;;  %v3003_v5 = vmax.f32 %v3917_v57, 0.0  ;;  %v3005_v6 = vmax.f32 %v3929_v31, 0.0 }
 0x31a   :  { %v3006_v3 = vmax.f32 %v3918_v33, 0.0  ;;  %v3008_v4 = vmax.f32 %v3930_v29, 0.0 }
 0x31b   :  { %v3007_v7 = vmax.f32 %v3919_v61, 0.0  ;;  %v3009_v8 = vmax.f32 %v3931_v62, 0.0 }
 0x31c   :  { %v3026_v9 = vpack.c.bf16 %v3006_v3, %v3002_v63  ;;  %v3028_v10 = vpack.c.bf16 %v3008_v4, %v3004_v1 }
 0x31d   :  { %v3027_v11 = vpack.c.bf16 %v3007_v7, %v3003_v5  ;;  %v3029_v12 = vpack.c.bf16 %v3009_v8, %v3005_v6  ;;  %v2857_v35 = vpop.f32.mrb[16].mxu0  ;;  %v2983_v36 = vpop.f32.mrb[16].mxu1 }
 0x31e   :  { %v3920_v13 = vadd.f32 %v2857_v35, %v4915_v48  ;;  %v3932_v14 = vadd.f32 %v2983_v36, %v4919_v49  ;;  %v2859_v15 = vpop.f32.mrb[17].mxu0  ;;  %v2985_v16 = vpop.f32.mrb[17].mxu1 }
 0x31f   :  { %v3921_v38 = vadd.f32 %v2859_v15, %v4923_v50  ;;  %v3933_v18 = vadd.f32 %v2985_v16, %v4927_v51  ;;  %v2861_v19 = vpop.f32.mrb[18].mxu0  ;;  %v2987_v20 = vpop.f32.mrb[18].mxu1  ;;  %3333 = vmatprep.mubr.bf16.mxu0 %v3027_v11  ;;  %3390 = vmatprep.mubr.bf16.mxu1 %v3029_v12 }
 0x320   :  { %v3922_v21 = vadd.f32 %v2861_v19, %v4915_v48  ;;  %v3934_v22 = vadd.f32 %v2987_v20, %v4919_v49  ;;  %v2863_v0 = vpop.f32.mrb[19].mxu0  ;;  %v2989_v47 = vpop.f32.mrb[19].mxu1  ;;  %3334 = vmatmul.mubr.bf16.vlgmr.msra.gmra.mrb[24].mxu0 %v3026_v9  ;;  %3391 = vmatmul.mubr.bf16.vlgmr.msra.gmra.mrb[24].mxu1 %v3028_v10  ;;  %v3010_v25 = vmax.f32 %v3920_v13, 0.0  ;;  %v3012_v26 = vmax.f32 %v3932_v14, 0.0 }
 0x321   :  { %v3923_v23 = vadd.f32 %v2863_v0, %v4923_v50  ;;  %v3935_v24 = vadd.f32 %v2989_v47, %v4927_v51  ;;  %v3011_v45 = vmax.f32 %v3921_v38, 0.0  ;;  %v3013_v17 = vmax.f32 %v3933_v18, 0.0 }
 0x322   :  { %v3014_v27 = vmax.f32 %v3922_v21, 0.0  ;;  %v3016_v28 = vmax.f32 %v3934_v22, 0.0 }
 0x323   :  { %v3015_v32 = vmax.f32 %v3923_v23, 0.0  ;;  %v3017_v39 = vmax.f32 %v3935_v24, 0.0 }
 0x324   :  { %v3030_v40 = vpack.c.bf16 %v3014_v27, %v3010_v25  ;;  %v3032_v41 = vpack.c.bf16 %v3016_v28, %v3012_v26 }
 0x325   :  { %v3031_v2 = vpack.c.bf16 %v3015_v32, %v3011_v45  ;;  %v3033_v42 = vpack.c.bf16 %v3017_v39, %v3013_v17  ;;  %v2867_v43 = vpop.f32.mrb[20].mxu0  ;;  %v2993_v44 = vpop.f32.mrb[20].mxu1 }
 0x326   :  { %v3924_v37 = vadd.f32 %v2867_v43, %v4915_v48  ;;  %v3936_v46 = vadd.f32 %v2993_v44, %v4919_v49  ;;  %v2869_v52 = vpop.f32.mrb[21].mxu0  ;;  %v2995_v53 = vpop.f32.mrb[21].mxu1 }
 0x327   :  { %v3925_v54 = vadd.f32 %v2869_v52, %v4923_v50  ;;  %v3937_v55 = vadd.f32 %v2995_v53, %v4927_v51  ;;  %v2871_v30 = vpop.f32.mrb[22].mxu0  ;;  %v2997_v56 = vpop.f32.mrb[22].mxu1  ;;  %3341 = vmatprep.mubr.bf16.mxu0 %v3031_v2  ;;  %3398 = vmatprep.mubr.bf16.mxu1 %v3033_v42 }
 0x328   :  { %v3926_v57 = vadd.f32 %v2871_v30, %v4915_v48  ;;  %v3938_v31 = vadd.f32 %v2997_v56, %v4919_v49  ;;  %v2873_v58 = vpop.f32.mrb[23].mxu0  ;;  %v2999_v59 = vpop.f32.mrb[23].mxu1  ;;  %3342 = vmatmul.mubr.bf16.gmra.mrb[28].mxu0 %v3030_v40  ;;  %3399 = vmatmul.mubr.bf16.gmra.mrb[28].mxu1 %v3032_v41  ;;  %v3018_v34 = vmax.f32 %v3924_v37, 0.0  ;;  %v3020_v60 = vmax.f32 %v3936_v46, 0.0 }
 0x329   :  { %v3927_v33 = vadd.f32 %v2873_v58, %v4923_v50  ;;  %v3939_v29 = vadd.f32 %v2999_v59, %v4927_v51  ;;  %v3019_v63 = vmax.f32 %v3925_v54, 0.0  ;;  %v3021_v1 = vmax.f32 %v3937_v55, 0.0  ;;  %v3791_v51 = vld [vmem:[%s4974_s6] ss:$0 sm:$0xff]  ;;  %s4727_s6 = smov [#allocation10]  }
 0x32a   :  { %v3022_v61 = vmax.f32 %v3926_v57, 0.0  ;;  %v3024_v62 = vmax.f32 %v3938_v31, 0.0  ;;  %s3426_s8 = sshll.u32 %s4727_s6, 4  ;;  %s3427_s8 = int_to_ptr.vmem [resolvable:$true] %s3426_s8 }
 0x32b   :  { %v3023_v3 = vmax.f32 %v3927_v33, 0.0  ;;  %v3025_v4 = vmax.f32 %v3939_v29, 0.0  ;;  %s4686_s9 = scalar_lea.vmem %s3427_s8, 768  ;;  %p4691_p5 = scmp.lt.s32.totalorder %s3427_s8, %s3427_s8 }
 0x32c   :  { %v3034_v5 = vpack.c.bf16 %v3022_v61, %v3018_v34  ;;  %v3036_v48 = vpack.c.bf16 %v3024_v62, %v3020_v60  ;;  %p4687_p4 = scmp.ne.s32.totalorder %s3427_s8, %s4686_s9  ;;  %p4692_p6 = scmp.lt.s32.totalorder %s4686_s9, %s4686_s9 }
 0x32d   :  { %v3035_v6 = vpack.c.bf16 %v3023_v3, %v3019_v63  ;;  %v3037_v49 = vpack.c.bf16 %v3025_v4, %v3021_v1 }
 0x32e   :  { %p4693_p7 = por %p4692_p6, %p4691_p5 }
 0x32f   :  { %3349 = vmatprep.mubr.bf16.mxu0 %v3035_v6  ;;  %3406 = vmatprep.mubr.bf16.mxu1 %v3037_v49 }
 0x330   :  { %3350 = vmatmul.mubr.bf16.gmra.mrb[32].mxu0 %v3034_v5  ;;  %3407 = vmatmul.mubr.bf16.gmra.mrb[32].mxu1 %v3036_v48  ;;  %p4694_p8 = pnand %p4693_p7, %p4687_p4 }
 0x3f3   :  { %v3840_v7 = vpop.f32.mrb[24].mxu0  ;;  %v3874_v50 = vpop.f32.mrb[24].mxu1 }
 0x3f4   :  { %v3841_v8 = vpop.f32.mrb[25].mxu0  ;;  %v3875_v9 = vpop.f32.mrb[25].mxu1 }
 0x3f5   :  { %v3842_v10 = vadd.f32 %v3841_v8, %v3840_v7  ;;  %v3876_v11 = vadd.f32 %v3875_v9, %v3874_v50  ;;  %v3843_v12 = vpop.f32.mrb[26].mxu0  ;;  %v3877_v35 = vpop.f32.mrb[26].mxu1 }
 0x3f6   :  { %v3844_v36 = vpop.f32.mrb[27].mxu0  ;;  %v3878_v13 = vpop.f32.mrb[27].mxu1 }
 0x3f7   :  { %v3336_v14 = vadd.f32 %v3842_v10, %v3791_v51  ;;  %v3845_v15 = vadd.f32 %v3844_v36, %v3843_v12  ;;  %v3879_v16 = vadd.f32 %v3878_v13, %v3877_v35 }
 0x3f9   :  { %v3393_v38 = vadd.f32 %v3876_v11, %v3336_v14  ;;  %v3339_v18 = vadd.f32 %v3845_v15, %v3791_v51 }
 0x3fb   :  { %3415 = vst [vmem:[#allocation10] sm:$0xff] %v3393_v38  ;;  %v3396_v19 = vadd.f32 %v3879_v16, %v3339_v18  ;;  %v3846_v20 = vpop.f32.mrb[28].mxu0  ;;  %v3880_v21 = vpop.f32.mrb[28].mxu1 }
 0x3fc   :  { %v3847_v22 = vpop.f32.mrb[29].mxu0  ;;  %v3881_v0 = vpop.f32.mrb[29].mxu1 }
 0x3fd   :  { %3416 = vst [vmem:[#allocation10 + $0x8] sm:$0xff] %v3396_v19  ;;  %v3848_v47 = vadd.f32 %v3847_v22, %v3846_v20  ;;  %v3882_v23 = vadd.f32 %v3881_v0, %v3880_v21  ;;  %v3849_v24 = vpop.f32.mrb[30].mxu0  ;;  %v3883_v25 = vpop.f32.mrb[30].mxu1 }
 0x3fe   :  { %v3850_v26 = vpop.f32.mrb[31].mxu0  ;;  %v3884_v27 = vpop.f32.mrb[31].mxu1 }
 0x3ff   :  { %v3344_v28 = vadd.f32 %v3848_v47, %v3791_v51  ;;  %v3851_v45 = vadd.f32 %v3850_v26, %v3849_v24  ;;  %v3885_v17 = vadd.f32 %v3884_v27, %v3883_v25 }
 0x401   :  { %v3401_v32 = vadd.f32 %v3882_v23, %v3344_v28  ;;  %v3347_v39 = vadd.f32 %v3851_v45, %v3791_v51 }
 0x403   :  { %3417 = vst [vmem:[#allocation10 + $0x10] sm:$0xff] %v3401_v32  ;;  %v3404_v40 = vadd.f32 %v3885_v17, %v3347_v39  ;;  %v3852_v41 = vpop.f32.mrb[32].mxu0  ;;  %v3886_v2 = vpop.f32.mrb[32].mxu1 }
 0x404   :  { %v3853_v42 = vpop.f32.mrb[33].mxu0  ;;  %v3887_v43 = vpop.f32.mrb[33].mxu1 }
 0x405   :  { %3418 = vst [vmem:[#allocation10 + $0x18] sm:$0xff] %v3404_v40  ;;  %v3854_v44 = vadd.f32 %v3853_v42, %v3852_v41  ;;  %v3888_v37 = vadd.f32 %v3887_v43, %v3886_v2  ;;  %v3855_v46 = vpop.f32.mrb[34].mxu0  ;;  %v3889_v52 = vpop.f32.mrb[34].mxu1 }
 0x406   :  { %v3856_v53 = vpop.f32.mrb[35].mxu0  ;;  %v3890_v54 = vpop.f32.mrb[35].mxu1 }
 0x407   :  { %v3352_v55 = vadd.f32 %v3854_v44, %v3791_v51  ;;  %v3857_v30 = vadd.f32 %v3856_v53, %v3855_v46  ;;  %v3891_v56 = vadd.f32 %v3890_v54, %v3889_v52 }
 0x409   :  { %v3409_v57 = vadd.f32 %v3888_v37, %v3352_v55  ;;  %v3355_v31 = vadd.f32 %v3857_v30, %v3791_v51 }
 0x40b   :  { %3419 = vst [vmem:[#allocation10 + $0x20] sm:$0xff] %v3409_v57  ;;  %v3412_v58 = vadd.f32 %v3891_v56, %v3355_v31 }
 0x40d   :  { %3420 = vst [vmem:[#allocation10 + $0x28] sm:$0xff] %v3412_v58 }
 0x40e   :  { %4697 = shalt.err (!%p4694_p8)
}
 0x40f   :  { %s4698_s14 = scalar_lea.hbm %s4975_s7, 768 }
 0x410   :  { %p4699_p9 = scmp.ne.s32.totalorder %s4975_s7, %s4698_s14  ;;  %p4702_p10 = scmp.lt.u32.totalorder %s4698_s14, %s4975_s7 }
 0x412   :  { %p4704_p11 = pnand %p4702_p10, %p4699_p9 }
 0x414   :  { %4707 = shalt.err (!%p4704_p11)
}
 0x415   :  { %s4728_s16 = smov 128   ;;  %s4729_s19 = smov 8  }
 0x416   :  { %3432 = dma.vmem_to_hbm [thread:$0]  %s3427_s8, 768, %s4975_s7, [#allocation4], %s4728_s16, %s4728_s16, %s4729_s19  }
 0x417   :  { %4714 = dma.done.wait [#allocation4], 768  }
 0x418   :  { %4715 = vsyncadd [#allocation4], 4294966528 }
 0x419   :  { %3436 = vsyncpa [#allocation3], 1 }
 0x41a   :  { %3437 = vsyncpa [#allocation6], 1 }
 0x41b   :  { %3438 = vsyncpa [#allocation9], 1 }
 0x41c   :  { %3439 = vsyncpa [#allocation4], 1 }

</bundles_post_ra>
